<compile_context>
chip_gen: v6e
topology: v6e:2x2x1
jax: 0.10.0
libtpu: 0.0.40
codegen_flags: <defaults>
</compile_context>

<pallas_src>
import math
from dataclasses import dataclass
from typing import Optional

import jax
import jax.numpy as jnp
from jax.experimental import pallas as pl
from jax.experimental.pallas import tpu as pltpu


# ----------------------------- config ------------------------------------- #

@dataclass
class ModelArgs:
    dim: int = 128
    n_layers: int = 2
    n_heads: int = 4
    n_kv_heads: Optional[int] = 2
    vocab_size: int = 256
    multiple_of: int = 128
    ffn_dim_multiplier: Optional[float] = None
    norm_eps: float = 1e-5
    max_batch_size: int = 2
    max_seq_len: int = 8


def ffn_hidden_dim(args: ModelArgs) -> int:
    hidden = 4 * args.dim
    hidden = int(2 * hidden / 3)
    if args.ffn_dim_multiplier is not None:
        hidden = int(args.ffn_dim_multiplier * hidden)
    return args.multiple_of * ((hidden + args.multiple_of - 1) // args.multiple_of)


# --------------------------- small helpers --------------------------------- #

def _pick_tile(n: int) -> int:
    """Largest 128-multiple tile that divides n; falls back to the full dim."""
    for t in (512, 256, 128):
        if n > t and n % t == 0:
            return t
    return n


def _cparams(dim_semantics):
    # TODO(synk): at real dims, tune vmem_limit_bytes per generation (~64 MiB on v6e,
    # <=48 MiB on v7x) and tile wq/wk/wv output columns; toy dims need no override.
    return pltpu.CompilerParams(dimension_semantics=dim_semantics)


def _rotary_rows(head_dim: int, start_pos: int):
    """Pair-replicated cos/sin rows ([1, head_dim]) for a single decode position."""
    half = head_dim // 2
    inv_freq = 1.0 / (10000.0 ** (jnp.arange(0, head_dim, 2, dtype=jnp.float32)[:half]
                                  / head_dim))
    ang = float(start_pos) * inv_freq
    cos_r = jnp.repeat(jnp.cos(ang), 2)[None, :]      # c0,c0,c1,c1,...
    sin_r = jnp.repeat(jnp.sin(ang), 2)[None, :]
    return cos_r, sin_r


def _signed_swap(n: int) -> jax.Array:
    """(x @ P)[2i] = -x[2i+1], (x @ P)[2i+1] = x[2i].  Tiny O(head_dim^2) constant."""
    j = jnp.arange(n)
    sign = jnp.where(j % 2 == 1, 1.0, -1.0).astype(jnp.float32)
    return (j[:, None] == (j ^ 1)[None, :]).astype(jnp.float32) * sign[None, :]


# ------------------------- fused per-layer kernel --------------------------- #

def layer_block(h, lp, cos_r, sin_r, swap, start_pos, args):
    """One fused pallas_call: attention (+KV-cache write-back) and SwiGLU FFN."""
    B, D = h.shape
    H = args.n_heads
    n_kv = args.n_heads if args.n_kv_heads is None else args.n_kv_heads
    n_rep = H // n_kv
    hd = D // H
    G, T, _ = lp["cache_k"].shape            # G = n_kv * max_batch (kv-head major)
    Hd = lp["w1"].shape[1]
    TH = _pick_tile(Hd)
    eps = args.norm_eps
    scale = 1.0 / math.sqrt(hd)
    # TODO(synk): decode batch < max_batch_size would need a batch-sliced cache view.
    assert G == n_kv * B

    def kernel(h_ref, ag_ref, fg_ref, cos_ref, sin_ref, swap_ref,
               wq_ref, wk_ref, wv_ref, wo_ref, w1_ref, w3_ref, w2_ref,
               ck_in_ref, cv_in_ref,
               o_ref, ck_out_ref, cv_out_ref,
               xn_scr, acc_scr):
        step = pl.program_id(0)

        @pl.when(step == 0)
        def _attention():
            x = h_ref[...]                                   # [B, D] f32
            ms = jnp.mean(x * x, axis=-1, keepdims=True)
            xa = (ag_ref[...] * (x * jax.lax.rsqrt(ms + eps))).astype(jnp.bfloat16)
            cos = cos_ref[...]                               # [1, hd] f32
            sin = sin_ref[...]
            sw = swap_ref[...]                               # [hd, hd] f32

            # Carry the old bf16 cache forward, then write the current token's k/v in place.
            ck_out_ref[...] = ck_in_ref[...]
            cv_out_ref[...] = cv_in_ref[...]

            t_idx = jax.lax.broadcasted_iota(jnp.int32, (B, T), 1)
            h_attn = x                                       # residual accumulator [B, D]

            # TODO(synk): for long contexts, stream the KV cache over a grid axis with an
            # online-softmax accumulator instead of keeping the whole [G, T, hd] block resident.
            for g in range(n_kv):
                kg = jnp.dot(xa, wk_ref[g], preferred_element_type=jnp.float32)  # [B, hd]
                vg = jnp.dot(xa, wv_ref[g], preferred_element_type=jnp.float32)
                kg = kg * cos + jnp.dot(kg, sw, preferred_element_type=jnp.float32) * sin
                ck_out_ref[g * B:(g + 1) * B, start_pos:start_pos + 1, :] = (
                    kg.astype(jnp.bfloat16)[:, None, :])
                cv_out_ref[g * B:(g + 1) * B, start_pos:start_pos + 1, :] = (
                    vg.astype(jnp.bfloat16)[:, None, :])

                kc = ck_out_ref[g * B:(g + 1) * B, :, :]     # [B, T, hd] bf16, incl. current
                vc = cv_out_ref[g * B:(g + 1) * B, :, :]

                for r in range(n_rep):                       # GQA: slice q per kv group
                    h_i = g * n_rep + r
                    qh = jnp.dot(xa, wq_ref[h_i], preferred_element_type=jnp.float32)
                    qh = qh * cos + jnp.dot(qh, sw,
                                            preferred_element_type=jnp.float32) * sin
                    # Compact per-head scores [B, T]: cache-time on lanes, head_dim reduced.
                    s = jnp.sum(qh[:, None, :] * kc, axis=-1) * scale
                    s = jnp.where(t_idx <= start_pos, s, -1e30)
                    m = jnp.max(s, axis=-1, keepdims=True)
                    e = jnp.exp(s - m)
                    p = e / jnp.sum(e, axis=-1, keepdims=True)
                    oh = jnp.sum(p[:, :, None] * vc, axis=1)             # [B, hd] f32
                    h_attn = h_attn + jnp.dot(oh.astype(jnp.bfloat16), wo_ref[h_i],
                                              preferred_element_type=jnp.float32)

            # FFN pre-norm + residual accumulator; the hidden dim is streamed over the grid.
            ms2 = jnp.mean(h_attn * h_attn, axis=-1, keepdims=True)
            xn_scr[...] = (fg_ref[...] * (h_attn * jax.lax.rsqrt(ms2 + eps))
                           ).astype(jnp.bfloat16)
            acc_scr[...] = h_attn

        # Every grid step: one hidden tile of the SwiGLU FFN, accumulated into acc_scr.
        xn = xn_scr[...]
        h1 = jnp.dot(xn, w1_ref[...], preferred_element_type=jnp.float32)
        h3 = jnp.dot(xn, w3_ref[...], preferred_element_type=jnp.float32)
        gated = (h1 * jax.nn.sigmoid(h1)) * h3
        acc_scr[...] = acc_scr[...] + jnp.dot(gated.astype(jnp.bfloat16), w2_ref[...],
                                              preferred_element_type=jnp.float32)

        @pl.when(step == pl.num_programs(0) - 1)
        def _finalize():
            o_ref[...] = acc_scr[...]

    def full2(shape):
        return pl.BlockSpec(shape, lambda k: (0, 0))

    def full3(shape):
        return pl.BlockSpec(shape, lambda k: (0, 0, 0))

    in_specs = [
        full2((B, D)),           # h
        full2((1, D)),           # attention-norm gamma
        full2((1, D)),           # ffn-norm gamma
        full2((1, hd)),          # rotary cos row
        full2((1, hd)),          # rotary sin row
        full2((hd, hd)),         # rotary signed pair-swap (tiny)
        full3((H, D, hd)),       # wq  (per-head layout)
        full3((n_kv, D, hd)),    # wk  (per kv-head layout)
        full3((n_kv, D, hd)),    # wv
        full3((H, hd, D)),       # wo  (per-head rows)
        pl.BlockSpec((D, TH), lambda k: (0, k)),   # w1 column tiles (streamed)
        pl.BlockSpec((D, TH), lambda k: (0, k)),   # w3 column tiles (streamed)
        pl.BlockSpec((TH, D), lambda k: (k, 0)),   # w2 row tiles (streamed)
        full3((G, T, hd)),       # cache_k (bf16, aliased to output 1)
        full3((G, T, hd)),       # cache_v (bf16, aliased to output 2)
    ]
    out_specs = (
        full2((B, D)),
        full3((G, T, hd)),
        full3((G, T, hd)),
    )
    out_shape = (
        jax.ShapeDtypeStruct((B, D), jnp.float32),
        jax.ShapeDtypeStruct((G, T, hd), jnp.bfloat16),
        jax.ShapeDtypeStruct((G, T, hd), jnp.bfloat16),
    )

    return pl.pallas_call(
        kernel,
        out_shape=out_shape,
        grid_spec=pltpu.PrefetchScalarGridSpec(
            num_scalar_prefetch=0,
            grid=(Hd // TH,),
            in_specs=in_specs,
            out_specs=out_specs,
            scratch_shapes=[pltpu.VMEM((B, D), jnp.bfloat16),   # normalized FFN input
                            pltpu.VMEM((B, D), jnp.float32)],   # residual accumulator
        ),
        compiler_params=_cparams(("arbitrary",)),
        input_output_aliases={13: 1, 14: 2},    # in-place bf16 KV-cache write-back
    )(h, lp["attn_norm"].reshape(1, D), lp["ffn_norm"].reshape(1, D),
      cos_r, sin_r, swap,
      lp["wq"], lp["wk"], lp["wv"], lp["wo"],
      lp["w1"], lp["w3"], lp["w2"],
      lp["cache_k"], lp["cache_v"])


# -------------------- fused final norm + vocab projection ------------------- #

def norm_logits(h, gamma, w_out, eps):
    B, D = h.shape
    V = w_out.shape[1]
    TV = _pick_tile(V)

    def kernel(h_ref, g_ref, w_ref, o_ref, xn_scr):
        @pl.when(pl.program_id(0) == 0)
        def _():
            x = h_ref[...]
            ms = jnp.mean(x * x, axis=-1, keepdims=True)
            xn_scr[...] = (g_ref[...] * (x * jax.lax.rsqrt(ms + eps))).astype(jnp.bfloat16)

        o_ref[...] = jnp.dot(xn_scr[...], w_ref[...], preferred_element_type=jnp.float32)

    # Norm hoisted into a scratch at step 0 => vocab axis stays "arbitrary".
    # TODO(synk): on v7x recompute the norm per tile (or per core) to mark it "parallel".
    return pl.pallas_call(
        kernel,
        out_shape=jax.ShapeDtypeStruct((B, V), jnp.float32),
        grid_spec=pltpu.PrefetchScalarGridSpec(
            num_scalar_prefetch=0,
            grid=(V // TV,),
            in_specs=[pl.BlockSpec((B, D), lambda j: (0, 0)),
                      pl.BlockSpec((1, D), lambda j: (0, 0)),
                      pl.BlockSpec((D, TV), lambda j: (0, j))],   # vocab columns streamed
            out_specs=pl.BlockSpec((B, TV), lambda j: (0, j)),
            scratch_shapes=[pltpu.VMEM((B, D), jnp.bfloat16)]),
        compiler_params=_cparams(("arbitrary",)),
    )(h, gamma.reshape(1, D), w_out)


# ------------------------------ model -------------------------------------- #

def init_params(key, args: ModelArgs):
    hdim = ffn_hidden_dim(args)
    n_kv = args.n_heads if args.n_kv_heads is None else args.n_kv_heads
    hd = args.dim // args.n_heads
    wdt = jnp.bfloat16   # weights stored bf16; MXU accumulates in f32

    def dense(k, shape, scale=0.02):
        return (scale * jax.random.normal(k, shape, dtype=jnp.float32)).astype(wdt)

    keys = jax.random.split(key, 2 + args.n_layers)
    params = {
        "tok_emb": dense(keys[0], (args.vocab_size, args.dim)),
        "out_w": dense(keys[1], (args.dim, args.vocab_size)),
        "final_norm": jnp.ones((args.dim,), jnp.float32),
        "layers": [],
    }
    G = n_kv * args.max_batch_size
    for li in range(args.n_layers):
        lk = jax.random.split(keys[2 + li], 7)
        params["layers"].append({
            # Per-head weight layouts so the kernel indexes heads on the leading dim
            # (no in-kernel lane->sublane reshapes of activations or weights).
            "wq": dense(lk[0], (args.n_heads, args.dim, hd)),
            "wk": dense(lk[1], (n_kv, args.dim, hd)),
            "wv": dense(lk[2], (n_kv, args.dim, hd)),
            "wo": dense(lk[3], (args.n_heads, hd, args.dim)),
            "w1": dense(lk[4], (args.dim, hdim)),
            "w3": dense(lk[5], (args.dim, hdim)),
            "w2": dense(lk[6], (hdim, args.dim)),
            "attn_norm": jnp.ones((args.dim,), jnp.float32),
            "ffn_norm": jnp.ones((args.dim,), jnp.float32),
            # bf16 KV cache, layout [n_kv * max_batch, max_seq_len, head_dim]
            # (kv-head major, batch minor) so the kernel reads/writes it directly.
            "cache_k": jnp.zeros((G, args.max_seq_len, hd), jnp.bfloat16),
            "cache_v": jnp.zeros((G, args.max_seq_len, hd), jnp.bfloat16),
        })
    return params


def transformer_forward(params, tokens: jax.Array, start_pos: int, args: ModelArgs):
    B, S = tokens.shape
    assert S == 1, "Only one token at a time can be processed"
    assert 0 <= start_pos < args.max_seq_len
    hd = args.dim // args.n_heads

    # TODO(synk): token-embedding gather stays in plain JAX indexing.
    h = params["tok_emb"][tokens[:, 0]].astype(jnp.float32)          # [B, D]

    cos_r, sin_r = _rotary_rows(hd, start_pos)
    swap = _signed_swap(hd)

    for lp in params["layers"]:
        h, new_ck, new_cv = layer_block(h, lp, cos_r, sin_r, swap, start_pos, args)
        lp["cache_k"] = new_ck     # aliased outputs: cache updated in place in HBM
        lp["cache_v"] = new_cv

    logits = norm_logits(h, params["final_norm"], params["out_w"], args.norm_eps)
    return logits.reshape(B, 1, args.vocab_size).astype(jnp.float32)


# ------------------------------- main --------------------------------------- #

if __name__ == "__main__":
    args = ModelArgs(dim=128, n_layers=2, n_heads=4, n_kv_heads=2, vocab_size=256,
                     multiple_of=128, norm_eps=1e-5, max_batch_size=2, max_seq_len=8)

    root = jax.random.PRNGKey(0)
    pkey, tkey = jax.random.split(root)
    params = init_params(pkey, args)

    tokens = jax.random.randint(tkey, (2, 1), 0, args.vocab_size, dtype=jnp.int32)
    start_pos = 3

    logits = transformer_forward(params, tokens, start_pos, args)
    logits = jax.block_until_ready(logits)

    assert logits.shape == (2, 1, args.vocab_size)
    assert logits.dtype == jnp.float32
    assert bool(jnp.all(jnp.isfinite(logits)))
    print("KERNEL_OK")
</pallas_src>

<mosaic_0001>
module attributes {stable_mosaic.version = 11 : i64} {
  func.func @kernel(%arg0: i32, %arg1: memref<2x128xf32, #tpu.memory_space<vmem>>, %arg2: memref<1x128xf32, #tpu.memory_space<vmem>>, %arg3: memref<1x128xf32, #tpu.memory_space<vmem>>, %arg4: memref<1x32xf32, #tpu.memory_space<vmem>>, %arg5: memref<1x32xf32, #tpu.memory_space<vmem>>, %arg6: memref<32x32xf32, #tpu.memory_space<vmem>>, %arg7: memref<4x128x32xbf16, #tpu.memory_space<vmem>>, %arg8: memref<2x128x32xbf16, #tpu.memory_space<vmem>>, %arg9: memref<2x128x32xbf16, #tpu.memory_space<vmem>>, %arg10: memref<4x32x128xbf16, #tpu.memory_space<vmem>>, %arg11: memref<128x128xbf16, #tpu.memory_space<vmem>>, %arg12: memref<128x128xbf16, #tpu.memory_space<vmem>>, %arg13: memref<128x128xbf16, #tpu.memory_space<vmem>>, %arg14: memref<4x8x32xbf16, #tpu.memory_space<vmem>>, %arg15: memref<4x8x32xbf16, #tpu.memory_space<vmem>>, %arg16: memref<2x128xf32, #tpu.memory_space<vmem>>, %arg17: memref<4x8x32xbf16, #tpu.memory_space<vmem>>, %arg18: memref<4x8x32xbf16, #tpu.memory_space<vmem>>, %arg19: memref<2x128xbf16, #tpu.memory_space<vmem>>, %arg20: memref<2x128xf32, #tpu.memory_space<vmem>>) attributes {dimension_semantics = [#tpu.dimension_semantics<arbitrary>], iteration_bounds = array<i64: 3>, scalar_prefetch = 0 : i64, scratch_operands = 2 : i64, tpu.core_type = #tpu.core_type<tc>, window_params = [{pipeline_mode = #tpu.pipeline_mode<synchronous>, transform_indices = @transform_0, window_bounds = array<i64: 2, 128>}, {pipeline_mode = #tpu.pipeline_mode<synchronous>, transform_indices = @transform_1, window_bounds = array<i64: 1, 128>}, {pipeline_mode = #tpu.pipeline_mode<synchronous>, transform_indices = @transform_2, window_bounds = array<i64: 1, 128>}, {pipeline_mode = #tpu.pipeline_mode<synchronous>, transform_indices = @transform_3, window_bounds = array<i64: 1, 32>}, {pipeline_mode = #tpu.pipeline_mode<synchronous>, transform_indices = @transform_4, window_bounds = array<i64: 1, 32>}, {pipeline_mode = #tpu.pipeline_mode<synchronous>, transform_indices = @transform_5, window_bounds = array<i64: 32, 32>}, {pipeline_mode = #tpu.pipeline_mode<synchronous>, transform_indices = @transform_6, window_bounds = array<i64: 4, 128, 32>}, {pipeline_mode = #tpu.pipeline_mode<synchronous>, transform_indices = @transform_7, window_bounds = array<i64: 2, 128, 32>}, {pipeline_mode = #tpu.pipeline_mode<synchronous>, transform_indices = @transform_8, window_bounds = array<i64: 2, 128, 32>}, {pipeline_mode = #tpu.pipeline_mode<synchronous>, transform_indices = @transform_9, window_bounds = array<i64: 4, 32, 128>}, {transform_indices = @transform_10, window_bounds = array<i64: 128, 128>}, {transform_indices = @transform_11, window_bounds = array<i64: 128, 128>}, {transform_indices = @transform_12, window_bounds = array<i64: 128, 128>}, {pipeline_mode = #tpu.pipeline_mode<synchronous>, transform_indices = @transform_13, window_bounds = array<i64: 4, 8, 32>}, {pipeline_mode = #tpu.pipeline_mode<synchronous>, transform_indices = @transform_14, window_bounds = array<i64: 4, 8, 32>}, {pipeline_mode = #tpu.pipeline_mode<synchronous>, transform_indices = @transform_15, window_bounds = array<i64: 2, 128>}, {pipeline_mode = #tpu.pipeline_mode<synchronous>, transform_indices = @transform_16, window_bounds = array<i64: 4, 8, 32>}, {pipeline_mode = #tpu.pipeline_mode<synchronous>, transform_indices = @transform_17, window_bounds = array<i64: 4, 8, 32>}]} {
    %c0_i32 = arith.constant 0 : i32
    %0 = arith.cmpi eq, %arg0, %c0_i32 : i32
    %1 = arith.extui %0 : i1 to i32
    %c0_i32_0 = arith.constant 0 : i32
    %2 = arith.cmpi ne, %1, %c0_i32_0 : i32
    scf.if %2 {
      %c0_16 = arith.constant 0 : index
      %c0_17 = arith.constant 0 : index
      %24 = vector.load %arg1[%c0_16, %c0_17] : memref<2x128xf32, #tpu.memory_space<vmem>>, vector<2x128xf32>
      %25 = arith.mulf %24, %24 : vector<2x128xf32>
      %cst_18 = arith.constant dense<0.000000e+00> : vector<2xf32>
      %26 = vector.multi_reduction <add>, %25, %cst_18 [1] : vector<2x128xf32> to vector<2xf32>
      %27 = vector.shape_cast %26 : vector<2xf32> to vector<2x1xf32>
      %cst_19 = arith.constant 1.280000e+02 : f32
      %28 = vector.broadcast %cst_19 : f32 to vector<2x1xf32>
      %29 = arith.divf %27, %28 : vector<2x1xf32>
      %c0_20 = arith.constant 0 : index
      %c0_21 = arith.constant 0 : index
      %30 = vector.load %arg2[%c0_20, %c0_21] : memref<1x128xf32, #tpu.memory_space<vmem>>, vector<1x128xf32>
      %cst_22 = arith.constant 9.99999974E-6 : f32
      %31 = vector.broadcast %cst_22 : f32 to vector<2x1xf32>
      %32 = arith.addf %29, %31 : vector<2x1xf32>
      %33 = math.rsqrt %32 : vector<2x1xf32>
      %34 = vector.broadcast %33 : vector<2x1xf32> to vector<2x128xf32>
      %35 = arith.mulf %24, %34 : vector<2x128xf32>
      %36 = vector.broadcast %30 : vector<1x128xf32> to vector<2x128xf32>
      %37 = arith.mulf %36, %35 : vector<2x128xf32>
      %38 = arith.truncf %37 : vector<2x128xf32> to vector<2x128xbf16>
      %c0_23 = arith.constant 0 : index
      %c0_24 = arith.constant 0 : index
      %39 = vector.load %arg4[%c0_23, %c0_24] : memref<1x32xf32, #tpu.memory_space<vmem>>, vector<1x32xf32>
      %c0_25 = arith.constant 0 : index
      %c0_26 = arith.constant 0 : index
      %40 = vector.load %arg5[%c0_25, %c0_26] : memref<1x32xf32, #tpu.memory_space<vmem>>, vector<1x32xf32>
      %c0_27 = arith.constant 0 : index
      %c0_28 = arith.constant 0 : index
      %41 = vector.load %arg6[%c0_27, %c0_28] : memref<32x32xf32, #tpu.memory_space<vmem>>, vector<32x32xf32>
      %c0_29 = arith.constant 0 : index
      %c0_30 = arith.constant 0 : index
      %c0_31 = arith.constant 0 : index
      %42 = vector.load %arg14[%c0_29, %c0_30, %c0_31] : memref<4x8x32xbf16, #tpu.memory_space<vmem>>, vector<4x8x32xbf16>
      %c0_32 = arith.constant 0 : index
      %c0_33 = arith.constant 0 : index
      %c0_34 = arith.constant 0 : index
      %43 = vector.load %arg17[%c0_32, %c0_33, %c0_34] : memref<4x8x32xbf16, #tpu.memory_space<vmem>>, vector<4x8x32xbf16>
      tpu.vector_store %arg17[%c0_32, %c0_33, %c0_34], %42 {strides = array<i32>} : memref<4x8x32xbf16, #tpu.memory_space<vmem>>, vector<4x8x32xbf16>,
      %c0_35 = arith.constant 0 : index
      %c0_36 = arith.constant 0 : index
      %c0_37 = arith.constant 0 : index
      %44 = vector.load %arg15[%c0_35, %c0_36, %c0_37] : memref<4x8x32xbf16, #tpu.memory_space<vmem>>, vector<4x8x32xbf16>
      %c0_38 = arith.constant 0 : index
      %c0_39 = arith.constant 0 : index
      %c0_40 = arith.constant 0 : index
      %45 = vector.load %arg18[%c0_38, %c0_39, %c0_40] : memref<4x8x32xbf16, #tpu.memory_space<vmem>>, vector<4x8x32xbf16>
      tpu.vector_store %arg18[%c0_38, %c0_39, %c0_40], %44 {strides = array<i32>} : memref<4x8x32xbf16, #tpu.memory_space<vmem>>, vector<4x8x32xbf16>,
      %46 = tpu.iota {dimensions = array<i32: 1>} : vector<2x8xi32>
      %c0_41 = arith.constant 0 : index
      %c0_42 = arith.constant 0 : index
      %c0_43 = arith.constant 0 : index
      %47 = vector.load %arg8[%c0_41, %c0_42, %c0_43] : memref<2x128x32xbf16, #tpu.memory_space<vmem>>, vector<1x128x32xbf16>
      %48 = vector.shape_cast %47 : vector<1x128x32xbf16> to vector<128x32xbf16>
      %cst_44 = arith.constant dense<0.000000e+00> : vector<2x32xf32>
      %49 = tpu.matmul %38, %48, %cst_44 {dimension_numbers = #tpu.dot_dimension_numbers<[1], [0], [0], [1], [0, 0, 1, 1], [], []>} : vector<2x128xbf16>, vector<128x32xbf16>, vector<2x32xf32> -> vector<2x32xf32>
      %c0_45 = arith.constant 0 : index
      %c0_46 = arith.constant 0 : index
      %c0_47 = arith.constant 0 : index
      %50 = vector.load %arg9[%c0_45, %c0_46, %c0_47] : memref<2x128x32xbf16, #tpu.memory_space<vmem>>, vector<1x128x32xbf16>
      %51 = vector.shape_cast %50 : vector<1x128x32xbf16> to vector<128x32xbf16>
      %cst_48 = arith.constant dense<0.000000e+00> : vector<2x32xf32>
      %52 = tpu.matmul %38, %51, %cst_48 {dimension_numbers = #tpu.dot_dimension_numbers<[1], [0], [0], [1], [0, 0, 1, 1], [], []>} : vector<2x128xbf16>, vector<128x32xbf16>, vector<2x32xf32> -> vector<2x32xf32>
      %53 = vector.broadcast %39 : vector<1x32xf32> to vector<2x32xf32>
      %54 = arith.mulf %49, %53 : vector<2x32xf32>
      %cst_49 = arith.constant dense<0.000000e+00> : vector<2x32xf32>
      %55 = tpu.matmul %49, %41, %cst_49 {dimension_numbers = #tpu.dot_dimension_numbers<[1], [0], [0], [1], [0, 0, 1, 1], [], []>} : vector<2x32xf32>, vector<32x32xf32>, vector<2x32xf32> -> vector<2x32xf32>
      %56 = vector.broadcast %40 : vector<1x32xf32> to vector<2x32xf32>
      %57 = arith.mulf %55, %56 : vector<2x32xf32>
      %58 = arith.addf %54, %57 : vector<2x32xf32>
      %59 = arith.truncf %58 : vector<2x32xf32> to vector<2x32xbf16>
      %60 = vector.shape_cast %59 : vector<2x32xbf16> to vector<2x1x32xbf16>
      %c0_50 = arith.constant 0 : index
      %c3 = arith.constant 3 : index
      %c0_51 = arith.constant 0 : index
      %61 = vector.load %arg17[%c0_50, %c3, %c0_51] : memref<4x8x32xbf16, #tpu.memory_space<vmem>>, vector<2x1x32xbf16>
      tpu.vector_store %arg17[%c0_50, %c3, %c0_51], %60 {strides = array<i32>} : memref<4x8x32xbf16, #tpu.memory_space<vmem>>, vector<2x1x32xbf16>,
      %62 = arith.truncf %52 : vector<2x32xf32> to vector<2x32xbf16>
      %63 = vector.shape_cast %62 : vector<2x32xbf16> to vector<2x1x32xbf16>
      %c0_52 = arith.constant 0 : index
      %c3_53 = arith.constant 3 : index
      %c0_54 = arith.constant 0 : index
      %64 = vector.load %arg18[%c0_52, %c3_53, %c0_54] : memref<4x8x32xbf16, #tpu.memory_space<vmem>>, vector<2x1x32xbf16>
      tpu.vector_store %arg18[%c0_52, %c3_53, %c0_54], %63 {strides = array<i32>} : memref<4x8x32xbf16, #tpu.memory_space<vmem>>, vector<2x1x32xbf16>,
      %c0_55 = arith.constant 0 : index
      %c0_56 = arith.constant 0 : index
      %c0_57 = arith.constant 0 : index
      %65 = vector.load %arg17[%c0_55, %c0_56, %c0_57] : memref<4x8x32xbf16, #tpu.memory_space<vmem>>, vector<2x8x32xbf16>
      %c0_58 = arith.constant 0 : index
      %c0_59 = arith.constant 0 : index
      %c0_60 = arith.constant 0 : index
      %66 = vector.load %arg18[%c0_58, %c0_59, %c0_60] : memref<4x8x32xbf16, #tpu.memory_space<vmem>>, vector<2x8x32xbf16>
      %c0_61 = arith.constant 0 : index
      %c0_62 = arith.constant 0 : index
      %c0_63 = arith.constant 0 : index
      %67 = vector.load %arg7[%c0_61, %c0_62, %c0_63] : memref<4x128x32xbf16, #tpu.memory_space<vmem>>, vector<1x128x32xbf16>
      %68 = vector.shape_cast %67 : vector<1x128x32xbf16> to vector<128x32xbf16>
      %cst_64 = arith.constant dense<0.000000e+00> : vector<2x32xf32>
      %69 = tpu.matmul %38, %68, %cst_64 {dimension_numbers = #tpu.dot_dimension_numbers<[1], [0], [0], [1], [0, 0, 1, 1], [], []>} : vector<2x128xbf16>, vector<128x32xbf16>, vector<2x32xf32> -> vector<2x32xf32>
      %70 = vector.broadcast %39 : vector<1x32xf32> to vector<2x32xf32>
      %71 = arith.mulf %69, %70 : vector<2x32xf32>
      %cst_65 = arith.constant dense<0.000000e+00> : vector<2x32xf32>
      %72 = tpu.matmul %69, %41, %cst_65 {dimension_numbers = #tpu.dot_dimension_numbers<[1], [0], [0], [1], [0, 0, 1, 1], [], []>} : vector<2x32xf32>, vector<32x32xf32>, vector<2x32xf32> -> vector<2x32xf32>
      %73 = vector.broadcast %40 : vector<1x32xf32> to vector<2x32xf32>
      %74 = arith.mulf %72, %73 : vector<2x32xf32>
      %75 = arith.addf %71, %74 : vector<2x32xf32>
      %76 = vector.shape_cast %75 : vector<2x32xf32> to vector<2x1x32xf32>
      %77 = arith.extf %65 : vector<2x8x32xbf16> to vector<2x8x32xf32>
      %78 = vector.broadcast %76 : vector<2x1x32xf32> to vector<2x8x32xf32>
      %79 = arith.mulf %78, %77 : vector<2x8x32xf32>
      %cst_66 = arith.constant dense<0.000000e+00> : vector<2x8xf32>
      %80 = vector.multi_reduction <add>, %79, %cst_66 [2] : vector<2x8x32xf32> to vector<2x8xf32>
      %cst_67 = arith.constant 0.176776692 : f32
      %81 = vector.broadcast %cst_67 : f32 to vector<2x8xf32>
      %82 = arith.mulf %80, %81 : vector<2x8xf32>
      %c3_i32 = arith.constant 3 : i32
      %83 = vector.broadcast %c3_i32 : i32 to vector<2x8xi32>
      %84 = arith.cmpi sle, %46, %83 : vector<2x8xi32>
      %cst_68 = arith.constant -1.000000e+30 : f32
      %85 = vector.broadcast %cst_68 : f32 to vector<2x8xf32>
      %86 = arith.select %84, %82, %85 : vector<2x8xi1>, vector<2x8xf32>
      %cst_69 = arith.constant dense<0xFF800000> : vector<2xf32>
      %87 = vector.multi_reduction <maximumf>, %86, %cst_69 [1] : vector<2x8xf32> to vector<2xf32>
      %88 = vector.shape_cast %87 : vector<2xf32> to vector<2x1xf32>
      %89 = vector.broadcast %88 : vector<2x1xf32> to vector<2x8xf32>
      %90 = arith.subf %86, %89 : vector<2x8xf32>
      %91 = math.exp %90 : vector<2x8xf32>
      %cst_70 = arith.constant dense<0.000000e+00> : vector<2xf32>
      %92 = vector.multi_reduction <add>, %91, %cst_70 [1] : vector<2x8xf32> to vector<2xf32>
      %93 = vector.shape_cast %92 : vector<2xf32> to vector<2x1xf32>
      %94 = vector.broadcast %93 : vector<2x1xf32> to vector<2x8xf32>
      %95 = arith.divf %91, %94 : vector<2x8xf32>
      %96 = vector.shape_cast %95 : vector<2x8xf32> to vector<2x8x1xf32>
      %97 = arith.extf %66 : vector<2x8x32xbf16> to vector<2x8x32xf32>
      %98 = vector.broadcast %96 : vector<2x8x1xf32> to vector<2x8x32xf32>
      %99 = arith.mulf %98, %97 : vector<2x8x32xf32>
      %cst_71 = arith.constant dense<0.000000e+00> : vector<2x32xf32>
      %100 = vector.multi_reduction <add>, %99, %cst_71 [1] : vector<2x8x32xf32> to vector<2x32xf32>
      %101 = arith.truncf %100 : vector<2x32xf32> to vector<2x32xbf16>
      %c0_72 = arith.constant 0 : index
      %c0_73 = arith.constant 0 : index
      %c0_74 = arith.constant 0 : index
      %102 = vector.load %arg10[%c0_72, %c0_73, %c0_74] : memref<4x32x128xbf16, #tpu.memory_space<vmem>>, vector<1x32x128xbf16>
      %103 = vector.shape_cast %102 : vector<1x32x128xbf16> to vector<32x128xbf16>
      %cst_75 = arith.constant dense<0.000000e+00> : vector<2x128xf32>
      %104 = tpu.matmul %101, %103, %cst_75 {dimension_numbers = #tpu.dot_dimension_numbers<[1], [0], [0], [1], [0, 0, 1, 1], [], []>} : vector<2x32xbf16>, vector<32x128xbf16>, vector<2x128xf32> -> vector<2x128xf32>
      %105 = arith.addf %24, %104 : vector<2x128xf32>
      %c1 = arith.constant 1 : index
      %c0_76 = arith.constant 0 : index
      %c0_77 = arith.constant 0 : index
      %106 = vector.load %arg7[%c1, %c0_76, %c0_77] : memref<4x128x32xbf16, #tpu.memory_space<vmem>>, vector<1x128x32xbf16>
      %107 = vector.shape_cast %106 : vector<1x128x32xbf16> to vector<128x32xbf16>
      %cst_78 = arith.constant dense<0.000000e+00> : vector<2x32xf32>
      %108 = tpu.matmul %38, %107, %cst_78 {dimension_numbers = #tpu.dot_dimension_numbers<[1], [0], [0], [1], [0, 0, 1, 1], [], []>} : vector<2x128xbf16>, vector<128x32xbf16>, vector<2x32xf32> -> vector<2x32xf32>
      %109 = vector.broadcast %39 : vector<1x32xf32> to vector<2x32xf32>
      %110 = arith.mulf %108, %109 : vector<2x32xf32>
      %cst_79 = arith.constant dense<0.000000e+00> : vector<2x32xf32>
      %111 = tpu.matmul %108, %41, %cst_79 {dimension_numbers = #tpu.dot_dimension_numbers<[1], [0], [0], [1], [0, 0, 1, 1], [], []>} : vector<2x32xf32>, vector<32x32xf32>, vector<2x32xf32> -> vector<2x32xf32>
      %112 = vector.broadcast %40 : vector<1x32xf32> to vector<2x32xf32>
      %113 = arith.mulf %111, %112 : vector<2x32xf32>
      %114 = arith.addf %110, %113 : vector<2x32xf32>
      %115 = vector.shape_cast %114 : vector<2x32xf32> to vector<2x1x32xf32>
      %116 = arith.extf %65 : vector<2x8x32xbf16> to vector<2x8x32xf32>
      %117 = vector.broadcast %115 : vector<2x1x32xf32> to vector<2x8x32xf32>
      %118 = arith.mulf %117, %116 : vector<2x8x32xf32>
      %cst_80 = arith.constant dense<0.000000e+00> : vector<2x8xf32>
      %119 = vector.multi_reduction <add>, %118, %cst_80 [2] : vector<2x8x32xf32> to vector<2x8xf32>
      %cst_81 = arith.constant 0.176776692 : f32
      %120 = vector.broadcast %cst_81 : f32 to vector<2x8xf32>
      %121 = arith.mulf %119, %120 : vector<2x8xf32>
      %c3_i32_82 = arith.constant 3 : i32
      %122 = vector.broadcast %c3_i32_82 : i32 to vector<2x8xi32>
      %123 = arith.cmpi sle, %46, %122 : vector<2x8xi32>
      %cst_83 = arith.constant -1.000000e+30 : f32
      %124 = vector.broadcast %cst_83 : f32 to vector<2x8xf32>
      %125 = arith.select %123, %121, %124 : vector<2x8xi1>, vector<2x8xf32>
      %cst_84 = arith.constant dense<0xFF800000> : vector<2xf32>
      %126 = vector.multi_reduction <maximumf>, %125, %cst_84 [1] : vector<2x8xf32> to vector<2xf32>
      %127 = vector.shape_cast %126 : vector<2xf32> to vector<2x1xf32>
      %128 = vector.broadcast %127 : vector<2x1xf32> to vector<2x8xf32>
      %129 = arith.subf %125, %128 : vector<2x8xf32>
      %130 = math.exp %129 : vector<2x8xf32>
      %cst_85 = arith.constant dense<0.000000e+00> : vector<2xf32>
      %131 = vector.multi_reduction <add>, %130, %cst_85 [1] : vector<2x8xf32> to vector<2xf32>
      %132 = vector.shape_cast %131 : vector<2xf32> to vector<2x1xf32>
      %133 = vector.broadcast %132 : vector<2x1xf32> to vector<2x8xf32>
      %134 = arith.divf %130, %133 : vector<2x8xf32>
      %135 = vector.shape_cast %134 : vector<2x8xf32> to vector<2x8x1xf32>
      %136 = arith.extf %66 : vector<2x8x32xbf16> to vector<2x8x32xf32>
      %137 = vector.broadcast %135 : vector<2x8x1xf32> to vector<2x8x32xf32>
      %138 = arith.mulf %137, %136 : vector<2x8x32xf32>
      %cst_86 = arith.constant dense<0.000000e+00> : vector<2x32xf32>
      %139 = vector.multi_reduction <add>, %138, %cst_86 [1] : vector<2x8x32xf32> to vector<2x32xf32>
      %140 = arith.truncf %139 : vector<2x32xf32> to vector<2x32xbf16>
      %c1_87 = arith.constant 1 : index
      %c0_88 = arith.constant 0 : index
      %c0_89 = arith.constant 0 : index
      %141 = vector.load %arg10[%c1_87, %c0_88, %c0_89] : memref<4x32x128xbf16, #tpu.memory_space<vmem>>, vector<1x32x128xbf16>
      %142 = vector.shape_cast %141 : vector<1x32x128xbf16> to vector<32x128xbf16>
      %cst_90 = arith.constant dense<0.000000e+00> : vector<2x128xf32>
      %143 = tpu.matmul %140, %142, %cst_90 {dimension_numbers = #tpu.dot_dimension_numbers<[1], [0], [0], [1], [0, 0, 1, 1], [], []>} : vector<2x32xbf16>, vector<32x128xbf16>, vector<2x128xf32> -> vector<2x128xf32>
      %144 = arith.addf %105, %143 : vector<2x128xf32>
      %c1_91 = arith.constant 1 : index
      %c0_92 = arith.constant 0 : index
      %c0_93 = arith.constant 0 : index
      %145 = vector.load %arg8[%c1_91, %c0_92, %c0_93] : memref<2x128x32xbf16, #tpu.memory_space<vmem>>, vector<1x128x32xbf16>
      %146 = vector.shape_cast %145 : vector<1x128x32xbf16> to vector<128x32xbf16>
      %cst_94 = arith.constant dense<0.000000e+00> : vector<2x32xf32>
      %147 = tpu.matmul %38, %146, %cst_94 {dimension_numbers = #tpu.dot_dimension_numbers<[1], [0], [0], [1], [0, 0, 1, 1], [], []>} : vector<2x128xbf16>, vector<128x32xbf16>, vector<2x32xf32> -> vector<2x32xf32>
      %c1_95 = arith.constant 1 : index
      %c0_96 = arith.constant 0 : index
      %c0_97 = arith.constant 0 : index
      %148 = vector.load %arg9[%c1_95, %c0_96, %c0_97] : memref<2x128x32xbf16, #tpu.memory_space<vmem>>, vector<1x128x32xbf16>
      %149 = vector.shape_cast %148 : vector<1x128x32xbf16> to vector<128x32xbf16>
      %cst_98 = arith.constant dense<0.000000e+00> : vector<2x32xf32>
      %150 = tpu.matmul %38, %149, %cst_98 {dimension_numbers = #tpu.dot_dimension_numbers<[1], [0], [0], [1], [0, 0, 1, 1], [], []>} : vector<2x128xbf16>, vector<128x32xbf16>, vector<2x32xf32> -> vector<2x32xf32>
      %151 = vector.broadcast %39 : vector<1x32xf32> to vector<2x32xf32>
      %152 = arith.mulf %147, %151 : vector<2x32xf32>
      %cst_99 = arith.constant dense<0.000000e+00> : vector<2x32xf32>
      %153 = tpu.matmul %147, %41, %cst_99 {dimension_numbers = #tpu.dot_dimension_numbers<[1], [0], [0], [1], [0, 0, 1, 1], [], []>} : vector<2x32xf32>, vector<32x32xf32>, vector<2x32xf32> -> vector<2x32xf32>
      %154 = vector.broadcast %40 : vector<1x32xf32> to vector<2x32xf32>
      %155 = arith.mulf %153, %154 : vector<2x32xf32>
      %156 = arith.addf %152, %155 : vector<2x32xf32>
      %157 = arith.truncf %156 : vector<2x32xf32> to vector<2x32xbf16>
      %158 = vector.shape_cast %157 : vector<2x32xbf16> to vector<2x1x32xbf16>
      %c2 = arith.constant 2 : index
      %c3_100 = arith.constant 3 : index
      %c0_101 = arith.constant 0 : index
      %159 = vector.load %arg17[%c2, %c3_100, %c0_101] : memref<4x8x32xbf16, #tpu.memory_space<vmem>>, vector<2x1x32xbf16>
      tpu.vector_store %arg17[%c2, %c3_100, %c0_101], %158 {strides = array<i32>} : memref<4x8x32xbf16, #tpu.memory_space<vmem>>, vector<2x1x32xbf16>,
      %160 = arith.truncf %150 : vector<2x32xf32> to vector<2x32xbf16>
      %161 = vector.shape_cast %160 : vector<2x32xbf16> to vector<2x1x32xbf16>
      %c2_102 = arith.constant 2 : index
      %c3_103 = arith.constant 3 : index
      %c0_104 = arith.constant 0 : index
      %162 = vector.load %arg18[%c2_102, %c3_103, %c0_104] : memref<4x8x32xbf16, #tpu.memory_space<vmem>>, vector<2x1x32xbf16>
      tpu.vector_store %arg18[%c2_102, %c3_103, %c0_104], %161 {strides = array<i32>} : memref<4x8x32xbf16, #tpu.memory_space<vmem>>, vector<2x1x32xbf16>,
      %c2_105 = arith.constant 2 : index
      %c0_106 = arith.constant 0 : index
      %c0_107 = arith.constant 0 : index
      %163 = vector.load %arg17[%c2_105, %c0_106, %c0_107] : memref<4x8x32xbf16, #tpu.memory_space<vmem>>, vector<2x8x32xbf16>
      %c2_108 = arith.constant 2 : index
      %c0_109 = arith.constant 0 : index
      %c0_110 = arith.constant 0 : index
      %164 = vector.load %arg18[%c2_108, %c0_109, %c0_110] : memref<4x8x32xbf16, #tpu.memory_space<vmem>>, vector<2x8x32xbf16>
      %c2_111 = arith.constant 2 : index
      %c0_112 = arith.constant 0 : index
      %c0_113 = arith.constant 0 : index
      %165 = vector.load %arg7[%c2_111, %c0_112, %c0_113] : memref<4x128x32xbf16, #tpu.memory_space<vmem>>, vector<1x128x32xbf16>
      %166 = vector.shape_cast %165 : vector<1x128x32xbf16> to vector<128x32xbf16>
      %cst_114 = arith.constant dense<0.000000e+00> : vector<2x32xf32>
      %167 = tpu.matmul %38, %166, %cst_114 {dimension_numbers = #tpu.dot_dimension_numbers<[1], [0], [0], [1], [0, 0, 1, 1], [], []>} : vector<2x128xbf16>, vector<128x32xbf16>, vector<2x32xf32> -> vector<2x32xf32>
      %168 = vector.broadcast %39 : vector<1x32xf32> to vector<2x32xf32>
      %169 = arith.mulf %167, %168 : vector<2x32xf32>
      %cst_115 = arith.constant dense<0.000000e+00> : vector<2x32xf32>
      %170 = tpu.matmul %167, %41, %cst_115 {dimension_numbers = #tpu.dot_dimension_numbers<[1], [0], [0], [1], [0, 0, 1, 1], [], []>} : vector<2x32xf32>, vector<32x32xf32>, vector<2x32xf32> -> vector<2x32xf32>
      %171 = vector.broadcast %40 : vector<1x32xf32> to vector<2x32xf32>
      %172 = arith.mulf %170, %171 : vector<2x32xf32>
      %173 = arith.addf %169, %172 : vector<2x32xf32>
      %174 = vector.shape_cast %173 : vector<2x32xf32> to vector<2x1x32xf32>
      %175 = arith.extf %163 : vector<2x8x32xbf16> to vector<2x8x32xf32>
      %176 = vector.broadcast %174 : vector<2x1x32xf32> to vector<2x8x32xf32>
      %177 = arith.mulf %176, %175 : vector<2x8x32xf32>
      %cst_116 = arith.constant dense<0.000000e+00> : vector<2x8xf32>
      %178 = vector.multi_reduction <add>, %177, %cst_116 [2] : vector<2x8x32xf32> to vector<2x8xf32>
      %cst_117 = arith.constant 0.176776692 : f32
      %179 = vector.broadcast %cst_117 : f32 to vector<2x8xf32>
      %180 = arith.mulf %178, %179 : vector<2x8xf32>
      %c3_i32_118 = arith.constant 3 : i32
      %181 = vector.broadcast %c3_i32_118 : i32 to vector<2x8xi32>
      %182 = arith.cmpi sle, %46, %181 : vector<2x8xi32>
      %cst_119 = arith.constant -1.000000e+30 : f32
      %183 = vector.broadcast %cst_119 : f32 to vector<2x8xf32>
      %184 = arith.select %182, %180, %183 : vector<2x8xi1>, vector<2x8xf32>
      %cst_120 = arith.constant dense<0xFF800000> : vector<2xf32>
      %185 = vector.multi_reduction <maximumf>, %184, %cst_120 [1] : vector<2x8xf32> to vector<2xf32>
      %186 = vector.shape_cast %185 : vector<2xf32> to vector<2x1xf32>
      %187 = vector.broadcast %186 : vector<2x1xf32> to vector<2x8xf32>
      %188 = arith.subf %184, %187 : vector<2x8xf32>
      %189 = math.exp %188 : vector<2x8xf32>
      %cst_121 = arith.constant dense<0.000000e+00> : vector<2xf32>
      %190 = vector.multi_reduction <add>, %189, %cst_121 [1] : vector<2x8xf32> to vector<2xf32>
      %191 = vector.shape_cast %190 : vector<2xf32> to vector<2x1xf32>
      %192 = vector.broadcast %191 : vector<2x1xf32> to vector<2x8xf32>
      %193 = arith.divf %189, %192 : vector<2x8xf32>
      %194 = vector.shape_cast %193 : vector<2x8xf32> to vector<2x8x1xf32>
      %195 = arith.extf %164 : vector<2x8x32xbf16> to vector<2x8x32xf32>
      %196 = vector.broadcast %194 : vector<2x8x1xf32> to vector<2x8x32xf32>
      %197 = arith.mulf %196, %195 : vector<2x8x32xf32>
      %cst_122 = arith.constant dense<0.000000e+00> : vector<2x32xf32>
      %198 = vector.multi_reduction <add>, %197, %cst_122 [1] : vector<2x8x32xf32> to vector<2x32xf32>
      %199 = arith.truncf %198 : vector<2x32xf32> to vector<2x32xbf16>
      %c2_123 = arith.constant 2 : index
      %c0_124 = arith.constant 0 : index
      %c0_125 = arith.constant 0 : index
      %200 = vector.load %arg10[%c2_123, %c0_124, %c0_125] : memref<4x32x128xbf16, #tpu.memory_space<vmem>>, vector<1x32x128xbf16>
      %201 = vector.shape_cast %200 : vector<1x32x128xbf16> to vector<32x128xbf16>
      %cst_126 = arith.constant dense<0.000000e+00> : vector<2x128xf32>
      %202 = tpu.matmul %199, %201, %cst_126 {dimension_numbers = #tpu.dot_dimension_numbers<[1], [0], [0], [1], [0, 0, 1, 1], [], []>} : vector<2x32xbf16>, vector<32x128xbf16>, vector<2x128xf32> -> vector<2x128xf32>
      %203 = arith.addf %144, %202 : vector<2x128xf32>
      %c3_127 = arith.constant 3 : index
      %c0_128 = arith.constant 0 : index
      %c0_129 = arith.constant 0 : index
      %204 = vector.load %arg7[%c3_127, %c0_128, %c0_129] : memref<4x128x32xbf16, #tpu.memory_space<vmem>>, vector<1x128x32xbf16>
      %205 = vector.shape_cast %204 : vector<1x128x32xbf16> to vector<128x32xbf16>
      %cst_130 = arith.constant dense<0.000000e+00> : vector<2x32xf32>
      %206 = tpu.matmul %38, %205, %cst_130 {dimension_numbers = #tpu.dot_dimension_numbers<[1], [0], [0], [1], [0, 0, 1, 1], [], []>} : vector<2x128xbf16>, vector<128x32xbf16>, vector<2x32xf32> -> vector<2x32xf32>
      %207 = vector.broadcast %39 : vector<1x32xf32> to vector<2x32xf32>
      %208 = arith.mulf %206, %207 : vector<2x32xf32>
      %cst_131 = arith.constant dense<0.000000e+00> : vector<2x32xf32>
      %209 = tpu.matmul %206, %41, %cst_131 {dimension_numbers = #tpu.dot_dimension_numbers<[1], [0], [0], [1], [0, 0, 1, 1], [], []>} : vector<2x32xf32>, vector<32x32xf32>, vector<2x32xf32> -> vector<2x32xf32>
      %210 = vector.broadcast %40 : vector<1x32xf32> to vector<2x32xf32>
      %211 = arith.mulf %209, %210 : vector<2x32xf32>
      %212 = arith.addf %208, %211 : vector<2x32xf32>
      %213 = vector.shape_cast %212 : vector<2x32xf32> to vector<2x1x32xf32>
      %214 = arith.extf %163 : vector<2x8x32xbf16> to vector<2x8x32xf32>
      %215 = vector.broadcast %213 : vector<2x1x32xf32> to vector<2x8x32xf32>
      %216 = arith.mulf %215, %214 : vector<2x8x32xf32>
      %cst_132 = arith.constant dense<0.000000e+00> : vector<2x8xf32>
      %217 = vector.multi_reduction <add>, %216, %cst_132 [2] : vector<2x8x32xf32> to vector<2x8xf32>
      %cst_133 = arith.constant 0.176776692 : f32
      %218 = vector.broadcast %cst_133 : f32 to vector<2x8xf32>
      %219 = arith.mulf %217, %218 : vector<2x8xf32>
      %c3_i32_134 = arith.constant 3 : i32
      %220 = vector.broadcast %c3_i32_134 : i32 to vector<2x8xi32>
      %221 = arith.cmpi sle, %46, %220 : vector<2x8xi32>
      %cst_135 = arith.constant -1.000000e+30 : f32
      %222 = vector.broadcast %cst_135 : f32 to vector<2x8xf32>
      %223 = arith.select %221, %219, %222 : vector<2x8xi1>, vector<2x8xf32>
      %cst_136 = arith.constant dense<0xFF800000> : vector<2xf32>
      %224 = vector.multi_reduction <maximumf>, %223, %cst_136 [1] : vector<2x8xf32> to vector<2xf32>
      %225 = vector.shape_cast %224 : vector<2xf32> to vector<2x1xf32>
      %226 = vector.broadcast %225 : vector<2x1xf32> to vector<2x8xf32>
      %227 = arith.subf %223, %226 : vector<2x8xf32>
      %228 = math.exp %227 : vector<2x8xf32>
      %cst_137 = arith.constant dense<0.000000e+00> : vector<2xf32>
      %229 = vector.multi_reduction <add>, %228, %cst_137 [1] : vector<2x8xf32> to vector<2xf32>
      %230 = vector.shape_cast %229 : vector<2xf32> to vector<2x1xf32>
      %231 = vector.broadcast %230 : vector<2x1xf32> to vector<2x8xf32>
      %232 = arith.divf %228, %231 : vector<2x8xf32>
      %233 = vector.shape_cast %232 : vector<2x8xf32> to vector<2x8x1xf32>
      %234 = arith.extf %164 : vector<2x8x32xbf16> to vector<2x8x32xf32>
      %235 = vector.broadcast %233 : vector<2x8x1xf32> to vector<2x8x32xf32>
      %236 = arith.mulf %235, %234 : vector<2x8x32xf32>
      %cst_138 = arith.constant dense<0.000000e+00> : vector<2x32xf32>
      %237 = vector.multi_reduction <add>, %236, %cst_138 [1] : vector<2x8x32xf32> to vector<2x32xf32>
      %238 = arith.truncf %237 : vector<2x32xf32> to vector<2x32xbf16>
      %c3_139 = arith.constant 3 : index
      %c0_140 = arith.constant 0 : index
      %c0_141 = arith.constant 0 : index
      %239 = vector.load %arg10[%c3_139, %c0_140, %c0_141] : memref<4x32x128xbf16, #tpu.memory_space<vmem>>, vector<1x32x128xbf16>
      %240 = vector.shape_cast %239 : vector<1x32x128xbf16> to vector<32x128xbf16>
      %cst_142 = arith.constant dense<0.000000e+00> : vector<2x128xf32>
      %241 = tpu.matmul %238, %240, %cst_142 {dimension_numbers = #tpu.dot_dimension_numbers<[1], [0], [0], [1], [0, 0, 1, 1], [], []>} : vector<2x32xbf16>, vector<32x128xbf16>, vector<2x128xf32> -> vector<2x128xf32>
      %242 = arith.addf %203, %241 : vector<2x128xf32>
      %243 = arith.mulf %242, %242 : vector<2x128xf32>
      %cst_143 = arith.constant dense<0.000000e+00> : vector<2xf32>
      %244 = vector.multi_reduction <add>, %243, %cst_143 [1] : vector<2x128xf32> to vector<2xf32>
      %245 = vector.shape_cast %244 : vector<2xf32> to vector<2x1xf32>
      %cst_144 = arith.constant 1.280000e+02 : f32
      %246 = vector.broadcast %cst_144 : f32 to vector<2x1xf32>
      %247 = arith.divf %245, %246 : vector<2x1xf32>
      %c0_145 = arith.constant 0 : index
      %c0_146 = arith.constant 0 : index
      %248 = vector.load %arg3[%c0_145, %c0_146] : memref<1x128xf32, #tpu.memory_space<vmem>>, vector<1x128xf32>
      %cst_147 = arith.constant 9.99999974E-6 : f32
      %249 = vector.broadcast %cst_147 : f32 to vector<2x1xf32>
      %250 = arith.addf %247, %249 : vector<2x1xf32>
      %251 = math.rsqrt %250 : vector<2x1xf32>
      %252 = vector.broadcast %251 : vector<2x1xf32> to vector<2x128xf32>
      %253 = arith.mulf %242, %252 : vector<2x128xf32>
      %254 = vector.broadcast %248 : vector<1x128xf32> to vector<2x128xf32>
      %255 = arith.mulf %254, %253 : vector<2x128xf32>
      %256 = arith.truncf %255 : vector<2x128xf32> to vector<2x128xbf16>
      %c0_148 = arith.constant 0 : index
      %c0_149 = arith.constant 0 : index
      %257 = vector.load %arg19[%c0_148, %c0_149] : memref<2x128xbf16, #tpu.memory_space<vmem>>, vector<2x128xbf16>
      tpu.vector_store %arg19[%c0_148, %c0_149], %256 {strides = array<i32>} : memref<2x128xbf16, #tpu.memory_space<vmem>>, vector<2x128xbf16>,
      %c0_150 = arith.constant 0 : index
      %c0_151 = arith.constant 0 : index
      %258 = vector.load %arg20[%c0_150, %c0_151] : memref<2x128xf32, #tpu.memory_space<vmem>>, vector<2x128xf32>
      tpu.vector_store %arg20[%c0_150, %c0_151], %242 {strides = array<i32>} : memref<2x128xf32, #tpu.memory_space<vmem>>, vector<2x128xf32>,
    } else {
    }
    %c0 = arith.constant 0 : index
    %c0_1 = arith.constant 0 : index
    %3 = vector.load %arg19[%c0, %c0_1] : memref<2x128xbf16, #tpu.memory_space<vmem>>, vector<2x128xbf16>
    %c0_2 = arith.constant 0 : index
    %c0_3 = arith.constant 0 : index
    %4 = vector.load %arg11[%c0_2, %c0_3] : memref<128x128xbf16, #tpu.memory_space<vmem>>, vector<128x128xbf16>
    %cst = arith.constant dense<0.000000e+00> : vector<2x128xf32>
    %5 = tpu.matmul %3, %4, %cst {dimension_numbers = #tpu.dot_dimension_numbers<[1], [0], [0], [1], [0, 0, 1, 1], [], []>} : vector<2x128xbf16>, vector<128x128xbf16>, vector<2x128xf32> -> vector<2x128xf32>
    %c0_4 = arith.constant 0 : index
    %c0_5 = arith.constant 0 : index
    %6 = vector.load %arg12[%c0_4, %c0_5] : memref<128x128xbf16, #tpu.memory_space<vmem>>, vector<128x128xbf16>
    %cst_6 = arith.constant dense<0.000000e+00> : vector<2x128xf32>
    %7 = tpu.matmul %3, %6, %cst_6 {dimension_numbers = #tpu.dot_dimension_numbers<[1], [0], [0], [1], [0, 0, 1, 1], [], []>} : vector<2x128xbf16>, vector<128x128xbf16>, vector<2x128xf32> -> vector<2x128xf32>
    %8 = arith.negf %5 : vector<2x128xf32>
    %9 = math.exp %8 : vector<2x128xf32>
    %cst_7 = arith.constant 1.000000e+00 : f32
    %10 = vector.broadcast %cst_7 : f32 to vector<2x128xf32>
    %11 = arith.addf %10, %9 : vector<2x128xf32>
    %12 = arith.divf %10, %11 : vector<2x128xf32>
    %13 = arith.mulf %5, %12 : vector<2x128xf32>
    %14 = arith.mulf %13, %7 : vector<2x128xf32>
    %c0_8 = arith.constant 0 : index
    %c0_9 = arith.constant 0 : index
    %15 = vector.load %arg20[%c0_8, %c0_9] : memref<2x128xf32, #tpu.memory_space<vmem>>, vector<2x128xf32>
    %16 = arith.truncf %14 : vector<2x128xf32> to vector<2x128xbf16>
    %c0_10 = arith.constant 0 : index
    %c0_11 = arith.constant 0 : index
    %17 = vector.load %arg13[%c0_10, %c0_11] : memref<128x128xbf16, #tpu.memory_space<vmem>>, vector<128x128xbf16>
    %cst_12 = arith.constant dense<0.000000e+00> : vector<2x128xf32>
    %18 = tpu.matmul %16, %17, %cst_12 {dimension_numbers = #tpu.dot_dimension_numbers<[1], [0], [0], [1], [0, 0, 1, 1], [], []>} : vector<2x128xbf16>, vector<128x128xbf16>, vector<2x128xf32> -> vector<2x128xf32>
    %19 = arith.addf %15, %18 : vector<2x128xf32>
    %c0_13 = arith.constant 0 : index
    %c0_14 = arith.constant 0 : index
    %20 = vector.load %arg20[%c0_13, %c0_14] : memref<2x128xf32, #tpu.memory_space<vmem>>, vector<2x128xf32>
    tpu.vector_store %arg20[%c0_13, %c0_14], %19 {strides = array<i32>} : memref<2x128xf32, #tpu.memory_space<vmem>>, vector<2x128xf32>,
    %c2_i32 = arith.constant 2 : i32
    %21 = arith.cmpi eq, %arg0, %c2_i32 : i32
    %22 = arith.extui %21 : i1 to i32
    %c0_i32_15 = arith.constant 0 : i32
    %23 = arith.cmpi ne, %22, %c0_i32_15 : i32
    scf.if %23 {
      %c0_16 = arith.constant 0 : index
      %c0_17 = arith.constant 0 : index
      %24 = vector.load %arg20[%c0_16, %c0_17] : memref<2x128xf32, #tpu.memory_space<vmem>>, vector<2x128xf32>
      %c0_18 = arith.constant 0 : index
      %c0_19 = arith.constant 0 : index
      %25 = vector.load %arg16[%c0_18, %c0_19] : memref<2x128xf32, #tpu.memory_space<vmem>>, vector<2x128xf32>
      tpu.vector_store %arg16[%c0_18, %c0_19], %24 {strides = array<i32>} : memref<2x128xf32, #tpu.memory_space<vmem>>, vector<2x128xf32>,
    } else {
    }
    return
  }
  func.func @transform_0(%arg0: i32) -> (i32, i32) {
    %c0_i32 = arith.constant 0 : i32
    %c0_i32_0 = arith.constant 0 : i32
    %c0_i32_1 = arith.constant 0 : i32
    return %c0_i32, %c0_i32_0 : i32, i32
  }
  func.func @transform_1(%arg0: i32) -> (i32, i32) {
    %c0_i32 = arith.constant 0 : i32
    %c0_i32_0 = arith.constant 0 : i32
    %c0_i32_1 = arith.constant 0 : i32
    return %c0_i32, %c0_i32_0 : i32, i32
  }
  func.func @transform_2(%arg0: i32) -> (i32, i32) {
    %c0_i32 = arith.constant 0 : i32
    %c0_i32_0 = arith.constant 0 : i32
    %c0_i32_1 = arith.constant 0 : i32
    return %c0_i32, %c0_i32_0 : i32, i32
  }
  func.func @transform_3(%arg0: i32) -> (i32, i32) {
    %c0_i32 = arith.constant 0 : i32
    %c0_i32_0 = arith.constant 0 : i32
    %c0_i32_1 = arith.constant 0 : i32
    return %c0_i32, %c0_i32_0 : i32, i32
  }
  func.func @transform_4(%arg0: i32) -> (i32, i32) {
    %c0_i32 = arith.constant 0 : i32
    %c0_i32_0 = arith.constant 0 : i32
    %c0_i32_1 = arith.constant 0 : i32
    return %c0_i32, %c0_i32_0 : i32, i32
  }
  func.func @transform_5(%arg0: i32) -> (i32, i32) {
    %c0_i32 = arith.constant 0 : i32
    %c0_i32_0 = arith.constant 0 : i32
    %c0_i32_1 = arith.constant 0 : i32
    return %c0_i32, %c0_i32_0 : i32, i32
  }
  func.func @transform_6(%arg0: i32) -> (i32, i32, i32) {
    %c0_i32 = arith.constant 0 : i32
    %c0_i32_0 = arith.constant 0 : i32
    %c0_i32_1 = arith.constant 0 : i32
    %c0_i32_2 = arith.constant 0 : i32
    return %c0_i32, %c0_i32_0, %c0_i32_1 : i32, i32, i32
  }
  func.func @transform_7(%arg0: i32) -> (i32, i32, i32) {
    %c0_i32 = arith.constant 0 : i32
    %c0_i32_0 = arith.constant 0 : i32
    %c0_i32_1 = arith.constant 0 : i32
    %c0_i32_2 = arith.constant 0 : i32
    return %c0_i32, %c0_i32_0, %c0_i32_1 : i32, i32, i32
  }
  func.func @transform_8(%arg0: i32) -> (i32, i32, i32) {
    %c0_i32 = arith.constant 0 : i32
    %c0_i32_0 = arith.constant 0 : i32
    %c0_i32_1 = arith.constant 0 : i32
    %c0_i32_2 = arith.constant 0 : i32
    return %c0_i32, %c0_i32_0, %c0_i32_1 : i32, i32, i32
  }
  func.func @transform_9(%arg0: i32) -> (i32, i32, i32) {
    %c0_i32 = arith.constant 0 : i32
    %c0_i32_0 = arith.constant 0 : i32
    %c0_i32_1 = arith.constant 0 : i32
    %c0_i32_2 = arith.constant 0 : i32
    return %c0_i32, %c0_i32_0, %c0_i32_1 : i32, i32, i32
  }
  func.func @transform_10(%arg0: i32) -> (i32, i32) {
    %c0_i32 = arith.constant 0 : i32
    %c0_i32_0 = arith.constant 0 : i32
    return %c0_i32, %arg0 : i32, i32
  }
  func.func @transform_11(%arg0: i32) -> (i32, i32) {
    %c0_i32 = arith.constant 0 : i32
    %c0_i32_0 = arith.constant 0 : i32
    return %c0_i32, %arg0 : i32, i32
  }
  func.func @transform_12(%arg0: i32) -> (i32, i32) {
    %c0_i32 = arith.constant 0 : i32
    %c0_i32_0 = arith.constant 0 : i32
    return %arg0, %c0_i32 : i32, i32
  }
  func.func @transform_13(%arg0: i32) -> (i32, i32, i32) {
    %c0_i32 = arith.constant 0 : i32
    %c0_i32_0 = arith.constant 0 : i32
    %c0_i32_1 = arith.constant 0 : i32
    %c0_i32_2 = arith.constant 0 : i32
    return %c0_i32, %c0_i32_0, %c0_i32_1 : i32, i32, i32
  }
  func.func @transform_14(%arg0: i32) -> (i32, i32, i32) {
    %c0_i32 = arith.constant 0 : i32
    %c0_i32_0 = arith.constant 0 : i32
    %c0_i32_1 = arith.constant 0 : i32
    %c0_i32_2 = arith.constant 0 : i32
    return %c0_i32, %c0_i32_0, %c0_i32_1 : i32, i32, i32
  }
  func.func @transform_15(%arg0: i32) -> (i32, i32) {
    %c0_i32 = arith.constant 0 : i32
    %c0_i32_0 = arith.constant 0 : i32
    %c0_i32_1 = arith.constant 0 : i32
    return %c0_i32, %c0_i32_0 : i32, i32
  }
  func.func @transform_16(%arg0: i32) -> (i32, i32, i32) {
    %c0_i32 = arith.constant 0 : i32
    %c0_i32_0 = arith.constant 0 : i32
    %c0_i32_1 = arith.constant 0 : i32
    %c0_i32_2 = arith.constant 0 : i32
    return %c0_i32, %c0_i32_0, %c0_i32_1 : i32, i32, i32
  }
  func.func @transform_17(%arg0: i32) -> (i32, i32, i32) {
    %c0_i32 = arith.constant 0 : i32
    %c0_i32_0 = arith.constant 0 : i32
    %c0_i32_1 = arith.constant 0 : i32
    %c0_i32_2 = arith.constant 0 : i32
    return %c0_i32, %c0_i32_0, %c0_i32_1 : i32, i32, i32
  }
}

</mosaic_0001>

<bundles_post_ra>
// kernel: tpu_custom_call.1
= control target key start
LH: loop header
LB: loop body
LE: loop exit
PB: predicated region body
PF: predicated region fallthrough
CT: control target
= control target key end

     0   :  { %s5663_s0 = inlined_call_operand.vmem [shape: f32[2,128], index: 0, kind: input, shape index: {}]   ;;  %s5664_s1 = inlined_call_operand.vmem [shape: f32[1,128], index: 1, kind: input, shape index: {}]   ;;  %s5665_s2 = inlined_call_operand.vmem [shape: f32[1,128], index: 2, kind: input, shape index: {}]   ;;  %s5666_s3 = inlined_call_operand.vmem [shape: f32[1,32], index: 3, kind: input, shape index: {}]   ;;  %s5667_s4 = inlined_call_operand.vmem [shape: f32[1,32], index: 4, kind: input, shape index: {}]   ;;  %s5668_s5 = inlined_call_operand.hbm [shape: f32[32,32], index: 5, kind: input, shape index: {}]   ;;  %s5669_s6 = inlined_call_operand.vmem [shape: bf16[4,128,32], index: 6, kind: input, shape index: {}]   ;;  %s5670_s7 = inlined_call_operand.vmem [shape: bf16[2,128,32], index: 7, kind: input, shape index: {}]   ;;  %s5671_s8 = inlined_call_operand.vmem [shape: bf16[2,128,32], index: 8, kind: input, shape index: {}]   ;;  %s5672_s9 = inlined_call_operand.vmem [shape: bf16[4,32,128], index: 9, kind: input, shape index: {}]   ;;  %s5673_s10 = inlined_call_operand.vmem [shape: bf16[128,384], index: 10, kind: input, shape index: {}]   ;;  %s5674_s11 = inlined_call_operand.vmem [shape: bf16[128,384], index: 11, kind: input, shape index: {}]   ;;  %s5675_s12 = inlined_call_operand.vmem [shape: bf16[384,128], index: 12, kind: input, shape index: {}]   ;;  %s5676_s13 = inlined_call_operand.hbm [shape: bf16[4,8,32], index: 13, kind: input, shape index: {}, may-alias: {13,16}]   ;;  %s5677_s14 = inlined_call_operand.hbm [shape: bf16[4,8,32], index: 14, kind: input, shape index: {}, may-alias: {14,17}]   ;;  %s5678_s15 = inlined_call_operand.hbm [shape: f32[2,128], index: 15, kind: output, shape index: {0}]   ;;  %s5679_s16 = inlined_call_operand.hbm [shape: bf16[4,8,32], index: 16, kind: output, shape index: {1}, may-alias: {13,16}]   ;;  %s5680_s17 = inlined_call_operand.hbm [shape: bf16[4,8,32], index: 17, kind: output, shape index: {2}, may-alias: {14,17}]  }
   0x1   :  { %5684 = sst [smem:[#allocation22_spill]] %s5663_s0 }
   0x2   :  { %5685 = sst [smem:[#allocation23_spill]] %s5664_s1 }
   0x3   :  { %5686 = sst [smem:[#allocation24_spill]] %s5678_s15 }
   0x4   :  { %5687 = sst [smem:[#allocation25_spill]] %s5679_s16 }
   0x5   :  { %5688 = sst [smem:[#allocation26_spill]] %s5680_s17 }
   0x6   :  { %23 = vsyncpa [#allocation5], 0 }
   0x7   :  { %24 = vsyncpa [#allocation10], 0 }
   0x8   :  { %25 = vsyncpa [#allocation6], 0 }
   0x9   :  { %26 = vsyncpa [#allocation14], 0  ;;  %s4761_s24 = smov 0   ;;  %s4763_s25 = smov 0  }
   0xa   :  { %s4765_s26 = smov 0  }
   0xb LB: > { %s4777_s27 = sadd.s32 4294967295, %s4651_s26   ;;  %s4780_s28 = sadd.s32 1, %s4651_s26   ;;  %s4651_s26 = sphi %s4765_s26, %s5701_s26   ;;  %s4647_s25 = sphi %s4763_s25, %s5704_s25   ;;  %s4643_s24 = sphi %s4761_s24, %s5703_s24  }
   0xc   : > { %5689 = sst [smem:[#allocation20_spill]] %s4780_s28  ;;  %s246_s29 = ssub.s32 %s4651_s26, %s4780_s28 }
   0xd   : > { %s249_s0 = sadd.s32 1, %s4647_s25  ;;  %p247_p0 = scmp.eq.s32.totalorder %s246_s29, 0 }
   0xe   : > { %p256_p1 = scmp.ne.s32.totalorder %s4647_s25, %s4643_s24  ;;  %p257_p2 = scmp.eq.s32.totalorder %s4651_s26, 0 }
   0xf   : > { %p3545_p3 = scmp.ge.s32.totalorder %s4651_s26, 1  ;;  %p430_p5 = scmp.lt.s32.totalorder %s4651_s26, 4 }
  0x10   : > { %s4790_s30 = scalar_select %p247_p0, %s4647_s25, %s249_s0  }
  0x11   : > { %p4792_p4 = por %p257_p2, %p256_p1  ;;  %p3546_p6 = scmp.ne.s32.totalorder %s4777_s27, 0 }
  0x12   : > { %5690 = sst [smem:[#allocation21_spill]] %s4790_s30  ;;  %p4288_p7 = scmp.eq.s32.totalorder %s4777_s27, 0 }
  0x13   : > { %p4799_p8 = pnand %p3545_p3, %p430_p5  ;;  %s4653_s1 = smov [#allocation9]  }
  0x14   : > { %s482_s20 = sshll.u32 %s4653_s1, 4  ;;  %s4654_s22 = smov [#allocation4]   ;;  %s483_s20 = int_to_ptr.vmem [resolvable:$true] %s482_s20 }
  0x15   : > { %p4278_p9 = pneg %p4799_p8  ;;  %s457_s23 = sshll.u32 %s4654_s22, 4  ;;  %s458_s23 = int_to_ptr.vmem [resolvable:$true] %s457_s23 }
  0x16   : > { %s4474_s29 = scalar_lea.vmem %s483_s20, 256  ;;  %p4482_p1 = scmp.lt.s32.totalorder %s483_s20, %s483_s20 }
  0x17   : > { %p4807_p10 = pnand %p4288_p7, %p4278_p9  ;;  %p4475_p12 = scmp.ne.s32.totalorder %s483_s20, %s4474_s29 }
  0x18   : > { %p4483_p2 = scmp.lt.s32.totalorder %s4474_s29, %s4474_s29 }
  0x19   : > { %p4465_p11 = pneg %p4807_p10 }
  0x1a   : > { %p4484_p3 = por %p4483_p2, %p4482_p1 }
  0x1b   : > { %p4477_p13 = pnand %p4475_p12, %p4465_p11 }
  0x1d   : > { %p4478_p0 = pneg %p4477_p13 }
  0x1f   : > { %p4485_p5 = pnand %p4484_p3, %p4478_p0 }
  0x21   : > { %4488 = shalt.err (!%p4485_p5)
}
  0x22   : > { %s4655_s0 = smov 64   ;;  %s4656_s1 = smov 4  }
  0x23   : > { %4284 = dma.hbm_to_vmem [thread:$0]  (!%p4807_p10), %s5676_s13, 256, %s483_s20, [#allocation10], %s4655_s0, %s4655_s0, %s4656_s1  }
  0x24   : > { %s4500_s28 = scalar_lea.vmem %s458_s23, 512  ;;  %p4508_p0 = scmp.lt.s32.totalorder %s458_s23, %s458_s23 }
  0x25   : > { %p4501_p9 = scmp.ne.s32.totalorder %s458_s23, %s4500_s28  ;;  %p4509_p1 = scmp.lt.s32.totalorder %s4500_s28, %s4500_s28 }
  0x27   : > { %p4503_p12 = pnand %p4501_p9, %p4465_p11  ;;  %p4510_p2 = por %p4509_p1, %p4508_p0 }
  0x29   : > { %p4504_p13 = pneg %p4503_p12 }
  0x2b   : > { %p4511_p3 = pnand %p4510_p2, %p4504_p13 }
  0x2d   : > { %4514 = shalt.err (!%p4511_p3)
}
  0x2e   : > { %s4657_s29 = smov 128   ;;  %s4658_s17 = smov 8  }
  0x2f   : > { %4281 = dma.hbm_to_vmem [thread:$0]  (!%p4807_p10), %s5668_s5, 512, %s458_s23, [#allocation5], %s4657_s29, %s4657_s29, %s4658_s17  }
  0x30   : > { %s4659_s30 = smov [#allocation11]  }
  0x31   : > { %s495_s20 = sshll.u32 %s4659_s30, 4  ;;  %s496_s20 = int_to_ptr.vmem [resolvable:$true] %s495_s20 }
  0x32   : > { %s4526_s22 = scalar_lea.vmem %s496_s20, 256  ;;  %p4534_p13 = scmp.lt.s32.totalorder %s496_s20, %s496_s20 }
  0x33   : > { %p4527_p5 = scmp.ne.s32.totalorder %s496_s20, %s4526_s22  ;;  %p4535_p0 = scmp.lt.s32.totalorder %s4526_s22, %s4526_s22 }
  0x35   : > { %p4529_p9 = pnand %p4527_p5, %p4465_p11  ;;  %p4536_p1 = por %p4535_p0, %p4534_p13 }
  0x37   : > { %p4530_p12 = pneg %p4529_p9 }
  0x39   : > { %p4537_p2 = pnand %p4536_p1, %p4530_p12 }
  0x3b   : > { %4540 = shalt.err (!%p4537_p2)
}
  0x3c   : > { %4287 = dma.hbm_to_vmem [thread:$0]  (!%p4807_p10), %s5677_s14, 256, %s496_s20, [#allocation10], %s4655_s0, %s4655_s0, %s4656_s1  }
  0x3d   : > { %p3549_p3 = scmp.ge.s32.totalorder %s4651_s26, 3 }
  0x3f   : > { %505 = sbr.rel (%p3549_p3) target bundleno = 96 (0x60), region = 64 }
  0x44   : > { %508 = sbr.rel (!%p4792_p4) target bundleno = 82 (0x52), region = 68  ;;  %s510_s17 = sand.u32 (%p4792_p4), 1, %s4647_s25  }
  0x45   : > { %s3551_s28 = sshll.u32 (%p4792_p4), %s4651_s26, 2  ;;  %s3550_s23 = sshll.u32 (%p4792_p4), %s510_s17, 6 }
  0x46   : > { %s4851_s30 = scalar_lea.vmem (%p4792_p4), %s5673_s10, %s3551_s28  ;;  %s512_s0 = scalar_lea.vmem (%p4792_p4), [#allocation7], %s3550_s23 }
  0x47   : > { %v531_v0 = vld [vmem:[%s4851_s30] sm:$0xf] (%p4792_p4)  ;;  %v533_v1 = vld [vmem:[%s4851_s30 + $0xc] sm:$0xf] (%p4792_p4)  ;;  %v535_v2 = vld [vmem:[%s4851_s30 + $0x18] sm:$0xf] (%p4792_p4) }
  0x48   : > { %532 = vst [vmem:[%s512_s0] sm:$0xf] (%p4792_p4), %v531_v0  ;;  %534 = vst [vmem:[%s512_s0 + $0x4] sm:$0xf] (%p4792_p4), %v533_v1  ;;  %v537_v3 = vld [vmem:[%s4851_s30 + $0x24] sm:$0xf] (%p4792_p4) }
  0x49   : > { %v539_v4 = vld [vmem:[%s4851_s30 + $0x30] sm:$0xf]  ;;  %536 = vst [vmem:[%s512_s0 + $0x8] sm:$0xf] %v535_v2  ;;  %538 = vst [vmem:[%s512_s0 + $0xc] sm:$0xf] %v537_v3 }
  0x4a   : > { %540 = vst [vmem:[%s512_s0 + $0x10] sm:$0xf] %v539_v4  ;;  %v541_v5 = vld [vmem:[%s4851_s30 + $0x3c] sm:$0xf]  ;;  %v543_v6 = vld [vmem:[%s4851_s30 + $0x48] sm:$0xf] }
  0x4b   : > { %v545_v7 = vld [vmem:[%s4851_s30 + $0x54] sm:$0xf]  ;;  %542 = vst [vmem:[%s512_s0 + $0x14] sm:$0xf] %v541_v5  ;;  %544 = vst [vmem:[%s512_s0 + $0x18] sm:$0xf] %v543_v6 }
  0x4c   : > { %546 = vst [vmem:[%s512_s0 + $0x1c] sm:$0xf] %v545_v7  ;;  %v547_v8 = vld [vmem:[%s4851_s30 + $0x60] sm:$0xf]  ;;  %v549_v9 = vld [vmem:[%s4851_s30 + $0x6c] sm:$0xf] }
  0x4d   : > { %v551_v10 = vld [vmem:[%s4851_s30 + $0x78] sm:$0xf]  ;;  %548 = vst [vmem:[%s512_s0 + $0x20] sm:$0xf] %v547_v8  ;;  %550 = vst [vmem:[%s512_s0 + $0x24] sm:$0xf] %v549_v9 }
  0x4e   : > { %552 = vst [vmem:[%s512_s0 + $0x28] sm:$0xf] %v551_v10  ;;  %v553_v11 = vld [vmem:[%s4851_s30 + $0x84] sm:$0xf]  ;;  %v555_v12 = vld [vmem:[%s4851_s30 + $0x90] sm:$0xf] }
  0x4f   : > { %v557_v13 = vld [vmem:[%s4851_s30 + $0x9c] sm:$0xf]  ;;  %554 = vst [vmem:[%s512_s0 + $0x2c] sm:$0xf] %v553_v11  ;;  %556 = vst [vmem:[%s512_s0 + $0x30] sm:$0xf] %v555_v12 }
  0x50   : > { %558 = vst [vmem:[%s512_s0 + $0x34] sm:$0xf] %v557_v13  ;;  %v559_v14 = vld [vmem:[%s4851_s30 + $0xa8] sm:$0xf]  ;;  %v561_v15 = vld [vmem:[%s4851_s30 + $0xb4] sm:$0xf] }
  0x51   : > { %560 = vst [vmem:[%s512_s0 + $0x38] sm:$0xf] %v559_v14  ;;  %562 = vst [vmem:[%s512_s0 + $0x3c] sm:$0xf] %v561_v15 }
  0x52 PF: > { %618 = sbr.rel (!%p4792_p4) target bundleno = 96 (0x60), region = 109  ;;  %s620_s1 = sand.u32 (%p4792_p4), 1, %s4647_s25  }
  0x53   : > { %s3553_s20 = sshll.u32 (%p4792_p4), %s4651_s26, 2  ;;  %s3552_s22 = sshll.u32 (%p4792_p4), %s620_s1, 6 }
  0x54   : > { %s4876_s17 = scalar_lea.vmem (%p4792_p4), %s5674_s11, %s3553_s20  ;;  %s622_s18 = scalar_lea.vmem (%p4792_p4), [#allocation8], %s3552_s22 }
  0x55   : > { %v641_v16 = vld [vmem:[%s4876_s17] sm:$0xf] (%p4792_p4)  ;;  %v643_v17 = vld [vmem:[%s4876_s17 + $0xc] sm:$0xf] (%p4792_p4)  ;;  %v645_v18 = vld [vmem:[%s4876_s17 + $0x18] sm:$0xf] (%p4792_p4) }
  0x56   : > { %642 = vst [vmem:[%s622_s18] sm:$0xf] (%p4792_p4), %v641_v16  ;;  %644 = vst [vmem:[%s622_s18 + $0x4] sm:$0xf] (%p4792_p4), %v643_v17  ;;  %v647_v19 = vld [vmem:[%s4876_s17 + $0x24] sm:$0xf] (%p4792_p4) }
  0x57   : > { %v649_v20 = vld [vmem:[%s4876_s17 + $0x30] sm:$0xf]  ;;  %646 = vst [vmem:[%s622_s18 + $0x8] sm:$0xf] %v645_v18  ;;  %648 = vst [vmem:[%s622_s18 + $0xc] sm:$0xf] %v647_v19 }
  0x58   : > { %650 = vst [vmem:[%s622_s18 + $0x10] sm:$0xf] %v649_v20  ;;  %v651_v21 = vld [vmem:[%s4876_s17 + $0x3c] sm:$0xf]  ;;  %v653_v22 = vld [vmem:[%s4876_s17 + $0x48] sm:$0xf] }
  0x59   : > { %v655_v23 = vld [vmem:[%s4876_s17 + $0x54] sm:$0xf]  ;;  %652 = vst [vmem:[%s622_s18 + $0x14] sm:$0xf] %v651_v21  ;;  %654 = vst [vmem:[%s622_s18 + $0x18] sm:$0xf] %v653_v22 }
  0x5a   : > { %656 = vst [vmem:[%s622_s18 + $0x1c] sm:$0xf] %v655_v23  ;;  %v657_v24 = vld [vmem:[%s4876_s17 + $0x60] sm:$0xf]  ;;  %v659_v25 = vld [vmem:[%s4876_s17 + $0x6c] sm:$0xf] }
  0x5b   : > { %v661_v26 = vld [vmem:[%s4876_s17 + $0x78] sm:$0xf]  ;;  %658 = vst [vmem:[%s622_s18 + $0x20] sm:$0xf] %v657_v24  ;;  %660 = vst [vmem:[%s622_s18 + $0x24] sm:$0xf] %v659_v25 }
  0x5c   : > { %662 = vst [vmem:[%s622_s18 + $0x28] sm:$0xf] %v661_v26  ;;  %v663_v27 = vld [vmem:[%s4876_s17 + $0x84] sm:$0xf]  ;;  %v665_v28 = vld [vmem:[%s4876_s17 + $0x90] sm:$0xf] }
  0x5d   : > { %v667_v29 = vld [vmem:[%s4876_s17 + $0x9c] sm:$0xf]  ;;  %664 = vst [vmem:[%s622_s18 + $0x2c] sm:$0xf] %v663_v27  ;;  %666 = vst [vmem:[%s622_s18 + $0x30] sm:$0xf] %v665_v28 }
  0x5e   : > { %668 = vst [vmem:[%s622_s18 + $0x34] sm:$0xf] %v667_v29  ;;  %v669_v30 = vld [vmem:[%s4876_s17 + $0xa8] sm:$0xf]  ;;  %v671_v31 = vld [vmem:[%s4876_s17 + $0xb4] sm:$0xf] }
  0x5f   : > { %670 = vst [vmem:[%s622_s18 + $0x38] sm:$0xf] %v669_v30  ;;  %672 = vst [vmem:[%s622_s18 + $0x3c] sm:$0xf] %v671_v31 }
  0x60 PF: > { %740 = sbr.rel (%p4799_p8) target bundleno = 5280 (0x14a0), region = 154 }
  0x65   : > { %4626 = dma.done.wait (%p4288_p7), [#allocation5], 512  }
  0x66   : > { %4628 = vsyncadd (%p4288_p7), [#allocation5], 4294966784  ;;  %s747_s26 = sand.u32 1, %s4643_s24  }
  0x67   : > { %s3556_s28 = sshll.u32 %s747_s26, 6 }
  0x68   : > { %s4901_s23 = scalar_lea.vmem [#allocation7], %s3556_s28  ;;  %s4903_s29 = scalar_lea.vmem [#allocation8], %s3556_s28 }
  0x69   : > { %4630 = dma.done.wait (%p4288_p7), [#allocation10], 512  }
  0x6a   : > { %4632 = vsyncadd (%p4288_p7), [#allocation10], 4294966784  ;;  %s3560_s19 = sshll.u32 %s4777_s27, 4  ;;  %s5694_s22 = sld [smem:[#allocation22_spill]] (!%p3546_p6) }
  0x6b   : > { %p818_p4 = scmp.lt.s32.totalorder %s3560_s19, 47  ;;  %827 = sbr.rel (%p3546_p6) target bundleno = 4766 (0x129e), region = 178 }
  0x6c   : > { %s5695_s24 = sld [smem:[#allocation23_spill]] (!%p3546_p6) }
  0x6d   : > { %s5706_s19 = smov (!%p818_p4, %s3560_s19), 47 }
  0x6e   : > { %s3561_s21 = sshll.u32 %s5706_s19, 2 }
  0x6f   : > { %s4913_s1 = scalar_lea.vmem %s5675_s12, %s3561_s21 }
  0x70   : > { %v4920_v32 = vld [vmem:[%s5694_s22] sm:$0x3]  ;;  %vm830_vm0 = vcmask 1041408   ;;  %v4660_v34 = vmov 0.0   ;;  %v4342_v35 = vld [vmem:[%s5671_s8 + $0x38] sm:$0xff]   ;;  %v4344_v38 = vld [vmem:[%s5671_s8 + $0x30] sm:$0xff]   ;;  %v871_v12 = vlaneseq }
  0x71   : > { %v829_v33 = vmul.f32 %v4920_v32, %v4920_v32  ;;  %3956 = vmatprep.subr.bf16.mxu1 %v4660_v34  ;;  %3936 = vmatprep.subr.bf16.mxu0 %v4660_v34  ;;  %v4343_v36 = vld [vmem:[%s5670_s7 + $0x38] sm:$0xff]   ;;  %v4345_v39 = vld [vmem:[%s5670_s7 + $0x30] sm:$0xff]   ;;  %v4346_v40 = vld [vmem:[%s5671_s8 + $0x28] sm:$0xff]   ;;  %vm4661_vm1 = vmmov 0   ;;  %vm858_vm2 = vcmask 257024   ;;  %v4663_v17 = vmov 286326784  }
  0x72   : > { %3957 = vmatpush3.bf16.msra.mxu1 %v4342_v35  ;;  %3937 = vmatpush3.bf16.msra.mxu0 %v4343_v36  ;;  %v4347_v41 = vld [vmem:[%s5670_s7 + $0x28] sm:$0xff]   ;;  %v4348_v42 = vld [vmem:[%s5671_s8 + $0x20] sm:$0xff]   ;;  %v4350_v44 = vld [vmem:[%s5671_s8 + $0x18] sm:$0xff]   ;;  %v4662_v13 = vmov 1966171168   ;;  %v5071_v16 = vshrl.u32 %v871_v12, 7  ;;  %v1191_v18 = vunpack.c.l.s4 %v4663_v17 }
  0x73   : > { %v831_v37 = vsel %vm830_vm0, %v829_v33, 0.0  ;;  %3958 = vmatprep.subr.bf16.mxu1 %v4660_v34  ;;  %3938 = vmatprep.subr.bf16.mxu0 %v4660_v34  ;;  %v4349_v43 = vld [vmem:[%s5670_s7 + $0x20] sm:$0xff]   ;;  %v4351_v45 = vld [vmem:[%s5670_s7 + $0x18] sm:$0xff]   ;;  %v4352_v46 = vld [vmem:[%s5671_s8 + $0x10] sm:$0xff]   ;;  %v1173_v14 = vunpack.c.l.s4 %v4662_v13  ;;  %vm1088_vm3 = vcmask 261120   ;;  %vm1206_vm4 = vcmask 254977  }
  0x74   : > { %832 = vadd.xlane.f32.xlu0 %v831_v37  ;;  %v4353_v47 = vld [vmem:[%s5670_s7 + $0x10] sm:$0xff]   ;;  %v4354_v48 = vld [vmem:[%s5671_s8 + $0x8] sm:$0xff]   ;;  %v4356_v50 = vld [vmem:[%s5671_s8] sm:$0xff]   ;;  %3952 = vmatprep.mubr.msk.bf16.mxu0 %vm4661_vm1, %v4660_v34  ;;  %v1192_v22 = vunpack.c.0.s8 %v1191_v18  ;;  %vm1207_vm5 = vsmask.f32 7942  ;;  %vm1497_vm7 = vcmask 1041409  }
  0x75   : > { %v4355_v49 = vld [vmem:[%s5670_s7 + $0x8] sm:$0xff]   ;;  %v4357_v51 = vld [vmem:[%s5670_s7] sm:$0xff]   ;;  %3972 = vmatprep.mubr.msk.bf16.mxu1 %vm4661_vm1, %v4660_v34  ;;  %v4358_v59 = vld [vmem:[%s5669_s6 + $0x38] sm:$0xff]   ;;  %v1174_v15 = vunpack.c.0.s8 %v1173_v14  ;;  %v5128_v14 = vsub.s32 0, %v5071_v16  ;;  %vm1501_vm9 = vcmask 58368  }
  0x76   : > { %3959 = vmatpush3.bf16.msra.mxu1 %v4344_v38  ;;  %3939 = vmatpush3.bf16.msra.mxu0 %v4345_v39  ;;  %v3563_v56 = vld [vmem:[%s5695_s24] ss:$0 sm:$0xff]  ;;  %v4359_v62 = vld [vmem:[%s5669_s6 + $0x30] sm:$0xff]   ;;  %v4360_v1 = vld [vmem:[%s5669_s6 + $0x28] sm:$0xff]   ;;  %v5084_v29 = vsub.s32 %v1192_v22, %v5071_v16 }
  0x77   : > { %3960 = vmatprep.subr.bf16.mxu1 %v4660_v34  ;;  %3940 = vmatprep.subr.bf16.mxu0 %v4660_v34  ;;  %v5004_v61 = vld [vmem:[#allocation4 + $0x18] sm:$0xff]  ;;  %v5013_v63 = vld [vmem:[#allocation4 + $0x10] sm:$0xff]  ;;  %v5018_v0 = vld [vmem:[#allocation4 + $0x8] sm:$0xff]  ;;  %v5074_v19 = vsub.s32 %v1174_v15, %v5071_v16 }
  0x78   : > { %v4361_v2 = vld [vmem:[%s5669_s6 + $0x20] sm:$0xff]   ;;  %v4362_v3 = vld [vmem:[%s5669_s6 + $0x18] sm:$0xff]   ;;  %v4363_v4 = vld [vmem:[%s5669_s6 + $0x10] sm:$0xff]  }
  0x79   : > { %v4364_v5 = vld [vmem:[%s5669_s6 + $0x8] sm:$0xff]   ;;  %v4365_v6 = vld [vmem:[%s5669_s6] sm:$0xff]   ;;  %v863_v8 = vld [vmem:[#allocation11] sm:$0xf] }
  0x7a   : > { %3961 = vmatpush3.bf16.msra.mxu1 %v4346_v40  ;;  %3941 = vmatpush3.bf16.msra.mxu0 %v4347_v41  ;;  %v5060_v7 = vld [vmem:[#allocation4] sm:$0xff]  ;;  %v864_v9 = vld [vmem:[#allocation11 + $0x4] sm:$0xf]  ;;  %867 = vst.msk [vmem:[#allocation15] sm:$0xf] %vm858_vm2, %v863_v8  ;;  %vm5090_vm6 = vmand %vm1206_vm4, %vm1207_vm5 }
  0x7b   : > { %3962 = vmatprep.subr.bf16.mxu1 %v4660_v34  ;;  %3942 = vmatprep.subr.bf16.mxu0 %v4660_v34  ;;  %868 = vst.msk [vmem:[#allocation15 + $0x4] sm:$0xf] %vm858_vm2, %v864_v9  ;;  %v854_v10 = vld [vmem:[#allocation9] sm:$0xf]  ;;  %v855_v11 = vld [vmem:[#allocation9 + $0x4] sm:$0xf] }
  0x7c   : > { %859 = vst.msk [vmem:[#allocation13] sm:$0xf] %vm858_vm2, %v854_v10  ;;  %860 = vst.msk [vmem:[#allocation13 + $0x4] sm:$0xf] %vm858_vm2, %v855_v11 }
  0x7e   : > { %3963 = vmatpush3.bf16.msra.mxu1 %v4348_v42  ;;  %3943 = vmatpush3.bf16.msra.mxu0 %v4349_v43 }
  0x7f   : > { %3964 = vmatprep.subr.bf16.mxu1 %v4660_v34  ;;  %3944 = vmatprep.subr.bf16.mxu0 %v4660_v34 }
  0x81   : > { %v1251_v37 = vld [vmem:[#allocation15] sm:$0x2] }
  0x82   : > { %3965 = vmatpush3.bf16.msra.mxu1 %v4350_v44  ;;  %3945 = vmatpush3.bf16.msra.mxu0 %v4351_v45  ;;  %v1254_v40 = vld [vmem:[#allocation15 + $0x4] sm:$0x2] }
  0x83   : > { %3966 = vmatprep.subr.bf16.mxu1 %v4660_v34  ;;  %3946 = vmatprep.subr.bf16.mxu0 %v4660_v34 }
  0x86   : > { %3967 = vmatpush3.bf16.msra.mxu1 %v4352_v46  ;;  %3947 = vmatpush3.bf16.msra.mxu0 %v4353_v47 }
  0x87   : > { %3968 = vmatprep.subr.bf16.mxu1 %v4660_v34  ;;  %3948 = vmatprep.subr.bf16.mxu0 %v4660_v34 }
  0x8a   : > { %3969 = vmatpush3.bf16.msra.mxu1 %v4354_v48  ;;  %3949 = vmatpush3.bf16.msra.mxu0 %v4355_v49  ;;  %v5108_v48 = vld [vmem:[%s5666_s3] ss:$0 sm:$0xff] }
  0x8b   : > { %3970 = vmatprep.subr.bf16.mxu1 %v4660_v34  ;;  %3950 = vmatprep.subr.bf16.mxu0 %v4660_v34  ;;  %v5113_v49 = vld [vmem:[%s5667_s4] ss:$0 sm:$0xff] }
  0x8e   : > { %3971 = vmatpush3.bf16.msra.mxu1 %v4356_v50  ;;  %3951 = vmatpush3.bf16.msra.mxu0 %v4357_v51 }
  0x8f   : > { %3987 = vmatprep.subr.bf16.mxu1 %v4660_v34  ;;  %3976 = vmatprep.subr.mxu0 %v4660_v34 }
  0xfd   : > { %v833_v52 = vpop.xlane.xlu0 %832 }
  0xfe   : > { %v835_v53 = vmul.f32 0.0078125, %v833_v52 }
 0x100   : > { %v837_v54 = vadd.f32 1e-05, %v835_v53 }
 0x102   : > { %4414 = vrsqrt.f32 %v837_v54 }
 0x10f   : > { %v4415_v55 = vpop.eup %4414 }
 0x110   : > { %v839_v57 = vmul.f32 %v4415_v55, %v4920_v32 }
 0x112   : > { %v846_v58 = vmul.f32 %v3563_v56, %v839_v57 }
 0x114   : > { %v5002_v60 = vpack.c.bf16 %v846_v58, %v846_v58 }
 0x116   : > { %3953 = vmatmul.mubr.bf16.vlgmr.msra.gmra.mxu0 %v5002_v60  ;;  %3973 = vmatmul.mubr.bf16.vlgmr.msra.gmra.mxu1 %v5002_v60 }
 0x117   : > { %3988 = vmatpush3.bf16.msra.mxu1 %v4358_v59  ;;  %4003 = vmatprep.mubr.msk.bf16.mxu1 %vm4661_vm1, %v4660_v34 }
 0x118   : > { %3989 = vmatprep.subr.bf16.mxu1 %v4660_v34  ;;  %3977 = vmatpush3.msra.mxu0 %v5004_v61 }
 0x119   : > { %3978 = vmatprep.subr.mxu0 %v4660_v34  ;;  %3984 = vmatprep.mubr.msk.f32.mxu0 %vm4661_vm1, %v4660_v34 }
 0x11a   : > { %3979 = vmatpush3.msra.mxu0 %v5013_v63 }
 0x11b   : > { %3990 = vmatpush3.bf16.msra.mxu1 %v4359_v62  ;;  %3980 = vmatprep.subr.mxu0 %v4660_v34  ;;  %v1209_v62 = vld [vmem:[#allocation13] sm:$0x2] }
 0x11c   : > { %3991 = vmatprep.subr.bf16.mxu1 %v4660_v34  ;;  %3981 = vmatpush3.msra.mxu0 %v5018_v0 }
 0x11d   : > { %3982 = vmatprep.subr.mxu0 %v4660_v34 }
 0x11e   : > { %3983 = vmatpush3.msra.mxu0 %v5060_v7 }
 0x11f   : > { %3992 = vmatpush3.bf16.msra.mxu1 %v4360_v1  ;;  %4007 = vmatprep.subr.mxu0 %v4660_v34 }
 0x120   : > { %3993 = vmatprep.subr.bf16.mxu1 %v4660_v34 }
 0x123   : > { %3994 = vmatpush3.bf16.msra.mxu1 %v4361_v2 }
 0x124   : > { %3995 = vmatprep.subr.bf16.mxu1 %v4660_v34 }
 0x127   : > { %3996 = vmatpush3.bf16.msra.mxu1 %v4362_v3  ;;  %v1212_v3 = vld [vmem:[#allocation13 + $0x4] sm:$0x2] }
 0x128   : > { %3997 = vmatprep.subr.bf16.mxu1 %v4660_v34 }
 0x12b   : > { %3998 = vmatpush3.bf16.msra.mxu1 %v4363_v4 }
 0x12c   : > { %3999 = vmatprep.subr.bf16.mxu1 %v4660_v34 }
 0x12f   : > { %4000 = vmatpush3.bf16.msra.mxu1 %v4364_v5 }
 0x130   : > { %4001 = vmatprep.subr.bf16.mxu1 %v4660_v34 }
 0x133   : > { %4002 = vmatpush3.bf16.msra.mxu1 %v4365_v6 }
 0x134   : > { %4046 = vmatprep.subr.mxu1 %v4660_v34 }
 0x136   : > { %4004 = vmatmul.mubr.bf16.vlgmr.msra.gmra.mxu1 %v5002_v60 }
 0x137   : > { %4047 = vmatpush3.msra.mxu1 %v5004_v61  ;;  %4054 = vmatprep.mubr.msk.f32.mxu1 %vm4661_vm1, %v4660_v34 }
 0x138   : > { %4048 = vmatprep.subr.mxu1 %v4660_v34 }
 0x139   : > { %4049 = vmatpush3.msra.mxu1 %v5013_v63 }
 0x13a   : > { %4050 = vmatprep.subr.mxu1 %v4660_v34 }
 0x13b   : > { %4051 = vmatpush3.msra.mxu1 %v5018_v0 }
 0x13c   : > { %4052 = vmatprep.subr.mxu1 %v4660_v34 }
 0x13d   : > { %4053 = vmatpush3.msra.mxu1 %v5060_v7 }
 0x13e   : > { %4057 = vmatprep.subr.bf16.mxu1 %v4660_v34 }
 0x1d6   : > { %v971_v20 = vpop.f32.mrf.mxu0  ;;  %v1075_v21 = vpop.f32.mrf.mxu1 }
 0x1d7   : > { %v1215_v23 = vpack.c.bf16 %v1075_v21, %v1075_v21  ;;  %3985 = vmatmul.mubr.msk.f32.vlgmr.msra.gmra.mxu0 %vm1088_vm3, %v971_v20  ;;  %v1087_v51 = vmul.f32 %v5108_v48, %v971_v20 }
 0x1d8   : > { %v3954_v24 = vpop.f32.mrf.mxu0  ;;  %v3974_v25 = vpop.f32.mrf.mxu1  ;;  %4008 = vmatpush3.msra.mxu0 %v5004_v61  ;;  %4015 = vmatprep.mubr.msk.f32.mxu0 %vm4661_vm1, %v4660_v34 }
 0x1d9   : > { %v1223_v26 = vrot.slane %v1215_v23, %v5074_v19  ;;  %4009 = vmatprep.subr.mxu0 %v4660_v34 }
 0x1da   : > { %v974_v27 = vpop.f32.mrf.mxu0  ;;  %v1078_v28 = vpop.f32.mrf.mxu1  ;;  %4010 = vmatpush3.msra.mxu0 %v5013_v63 }
 0x1db   : > { %v1230_v30 = vrot.slane %v1223_v26, %v5074_v19  ;;  %4011 = vmatprep.subr.mxu0 %v4660_v34 }
 0x1dc   : > { %v3955_v31 = vpop.f32.mrf.mxu0  ;;  %v3975_v32 = vpop.f32.mrf.mxu1  ;;  %4012 = vmatpush3.msra.mxu0 %v5018_v0 }
 0x1dd   : > { %v1232_v33 = vunpack.i.h.s16 %v1230_v30  ;;  %v3584_v35 = vpack.i.b16 %v1230_v30, %v1230_v30  ;;  %4013 = vmatprep.subr.mxu0 %v4660_v34  ;;  %v5146_v31 = vand.u32 127, %v871_v12 }
 0x1de   : > { %4014 = vmatpush3.msra.mxu0 %v5060_v7 }
 0x1df   : > { %v1234_v38 = vpack.i.b16 %v1232_v33, %v1232_v33  ;;  %v1241_v39 = vrot.slane %v3584_v35, %v5084_v29  ;;  %4018 = vmatprep.subr.bf16.mxu0 %v4660_v34  ;;  %v5150_v33 = vsub.s32 %v5146_v31, %v5071_v16  ;;  %vm1486_vm8 = vcmp.le.s32.totalorder %v5146_v31, 3 }
 0x1e1   : > { %v1248_v41 = vrot.slane %v1234_v38, %v5084_v29  ;;  %v1252_v42 = vsel %vm5090_vm6, %v1241_v39, %v1251_v37 }
 0x1e2   : > { %1253 = vst [vmem:[#allocation15] sm:$0x2] %v1252_v42 }
 0x1e3   : > { %v1255_v43 = vsel %vm5090_vm6, %v1248_v41, %v1254_v40 }
 0x1e4   : > { %1256 = vst [vmem:[#allocation15 + $0x4] sm:$0x2] %v1255_v43 }
 0x1f6   : > { %v1359_v44 = vpop.f32.mrf.mxu1 }
 0x1f7   : > { %4016 = vmatmul.mubr.msk.f32.vlgmr.msra.gmra.mxu0 %vm1088_vm3, %v1359_v44  ;;  %v1365_v9 = vmul.f32 %v5108_v48, %v1359_v44 }
 0x1f8   : > { %v4005_v45 = vpop.f32.mrf.mxu1  ;;  %4022 = vmatprep.mubr.msk.bf16.mxu0 %vm4661_vm1, %v4660_v34 }
 0x1fa   : > { %v1362_v46 = vpop.f32.mrf.mxu1 }
 0x1fc   : > { %v4006_v47 = vpop.f32.mrf.mxu1 }
 0x297   : > { %v1158_v50 = vpop.f32.mrf.mxu0 }
 0x298   : > { %v1168_v52 = vmul.f32 %v5113_v49, %v1158_v50 }
 0x299   : > { %v3986_v53 = vpop.f32.mrf.mxu0 }
 0x29a   : > { %v1169_v54 = vadd.f32 %v1168_v52, %v1087_v51  ;;  %v5161_v51 = vsub.s32 1, %v5071_v16  ;;  %v4367_v16 = vld [vmem:[%s5672_s9] sm:$0xff]  }
 0x29c   : > { %v1170_v55 = vpack.c.bf16 %v1169_v54, %v1169_v54 }
 0x29e   : > { %v1178_v56 = vrot.slane %v1170_v55, %v5074_v19 }
 0x2a0   : > { %v1185_v57 = vrot.slane %v1178_v56, %v5074_v19  ;;  %v4366_v56 = vld [vmem:[%s5672_s9 + $0x8] sm:$0xff]  }
 0x2a1   : > { %4019 = vmatpush3.bf16.msra.mxu0 %v4366_v56  ;;  %v4385_v56 = vld [vmem:[%s5669_s6 + $0xb0] sm:$0xff]  }
 0x2a2   : > { %v1187_v58 = vunpack.i.h.s16 %v1185_v57  ;;  %v3583_v59 = vpack.i.b16 %v1185_v57, %v1185_v57  ;;  %4020 = vmatprep.subr.bf16.mxu0 %v4660_v34  ;;  %v5173_v57 = vld [vmem:[#allocation15] sm:$0xff]  }
 0x2a4   : > { %v1189_v1 = vpack.i.b16 %v1187_v58, %v1187_v58  ;;  %v1196_v2 = vrot.slane %v3583_v59, %v5084_v29  ;;  %v3786_v58 = vunpack.c.h.bf16 %v5173_v57  ;;  %v3785_v59 = vunpack.c.l.bf16 %v5173_v57 }
 0x2a5   : > { %4021 = vmatpush3.bf16.msra.mxu0 %v4367_v16  ;;  %v4386_v16 = vld [vmem:[%s5669_s6 + $0xa8] sm:$0xff]  }
 0x2a6   : > { %v1203_v4 = vrot.slane %v1189_v1, %v5084_v29  ;;  %v1210_v5 = vsel %vm5090_vm6, %v1196_v2, %v1209_v62  ;;  %4026 = vmatprep.subr.bf16.mxu0 %v4660_v34 }
 0x2a7   : > { %1211 = vst [vmem:[#allocation13] sm:$0x2] %v1210_v5 }
 0x2a8   : > { %v1213_v6 = vsel %vm5090_vm6, %v1203_v4, %v1212_v3 }
 0x2a9   : > { %1214 = vst [vmem:[#allocation13 + $0x4] sm:$0x2] %v1213_v6 }
 0x2b0   : > { %v5131_v17 = vld [vmem:[#allocation13] sm:$0xff]  }
 0x2b1   : > { %v3781_v21 = vunpack.c.l.bf16 %v5131_v17  ;;  %v3782_v25 = vunpack.c.h.bf16 %v5131_v17 }
 0x2b7   : > { %v1435_v8 = vpop.f32.mrf.mxu0 }
 0x2b8   : > { %v1439_v10 = vmul.f32 %v5113_v49, %v1435_v8 }
 0x2b9   : > { %v4017_v11 = vpop.f32.mrf.mxu0 }
 0x2ba   : > { %v1440_v13 = vadd.f32 %v1439_v10, %v1365_v9 }
 0x2bc   : > { %v1448_v15 = vrot.slane %v1440_v13, %v5074_v19 }
 0x2be   : > { %v1449_v18 = vcombine.high %v1448_v15, %v1448_v15  ;;  %v1456_v20 = vrot.slane %v1448_v15, %v5074_v19 }
 0x2c0   : > { %v1469_v22 = vrot.slane %v1456_v20, %v5128_v14  ;;  %v1463_v23 = vrot.slane %v1449_v18, %v5074_v19 }
 0x2c2   : > { %v1476_v24 = vmul.f32 %v3781_v21, %v1469_v22  ;;  %v1473_v26 = vrot.slane %v1463_v23, %v5128_v14 }
 0x2c4   : > { %v1478_v27 = vsel %vm1088_vm3, %v1476_v24, 0.0  ;;  %v1477_v28 = vmul.f32 %v3782_v25, %v1473_v26 }
 0x2c5   : > { %1479 = vadd.xlane.f32.xlu0 %v1478_v27 }
 0x2c6   : > { %v1481_v30 = vsel %vm1088_vm3, %v1477_v28, 0.0 }
 0x2c7   : > { %1482 = vadd.xlane.f32.xlu1 %v1481_v30 }
 0x34e   : > { %v1480_v32 = vpop.xlane.xlu0 %1479 }
 0x34f   : > { %v1484_v35 = vmul.f32 0.17677669, %v1480_v32 }
 0x350   : > { %v1483_v37 = vpop.xlane.xlu1 %1482 }
 0x351   : > { %v1485_v38 = vmul.f32 0.17677669, %v1483_v37  ;;  %v1492_v39 = vrot.slane %v1484_v35, %v5150_v33  ;;  %v4368_v35 = vld [vmem:[%s5669_s6 + $0x78] sm:$0xff]  }
 0x353   : > { %v1496_v40 = vrot.slane %v1485_v38, %v5150_v33  ;;  %v4369_v38 = vld [vmem:[%s5669_s6 + $0x70] sm:$0xff]  }
 0x355   : > { %v1498_v41 = vsel %vm1497_vm7, %v1496_v40, %v1492_v39  ;;  %v4370_v39 = vld [vmem:[%s5669_s6 + $0x68] sm:$0xff]   ;;  %v4371_v40 = vld [vmem:[%s5669_s6 + $0x60] sm:$0xff]  }
 0x356   : > { %v1500_v12 = vsel %vm1486_vm8, %v1498_v41, -1e+30  ;;  %v4372_v41 = vld [vmem:[%s5669_s6 + $0x58] sm:$0xff]  }
 0x357   : > { %v1502_v42 = vsel %vm1501_vm9, %v1500_v12, -inf }
 0x358   : > { %1503 = vmax.xlane.f32.xlu1 %v1502_v42  ;;  %v4374_v42 = vld [vmem:[%s5669_s6 + $0x48] sm:$0xff]  }
 0x3e1   : > { %v1504_v43 = vpop.xlane.xlu1 %1503 }
 0x3e2   : > { %v1505_v44 = vsub.f32 %v1500_v12, %v1504_v43  ;;  %v4373_v12 = vld [vmem:[%s5669_s6 + $0x50] sm:$0xff]   ;;  %v4375_v43 = vld [vmem:[%s5669_s6 + $0x40] sm:$0xff]  }
 0x3e4   : > { %v1506_v45 = vmul.f32 1.442695, %v1505_v44  ;;  %v4376_v44 = vld [vmem:[%s5671_s8 + $0x78] sm:$0xff]  }
 0x3e6   : > { %4416 = vpow2.f32 %v1506_v45  ;;  %v4377_v45 = vld [vmem:[%s5671_s8 + $0x70] sm:$0xff]  }
 0x3f3   : > { %v4417_v46 = vpop.eup %4416 }
 0x3f4   : > { %v1508_v47 = vsel %vm1501_vm9, %v4417_v46, 0.0 }
 0x3f5   : > { %1509 = vadd.xlane.f32.xlu0 %v1508_v47  ;;  %v4379_v47 = vld [vmem:[%s5671_s8 + $0x60] sm:$0xff]  }
 0x47e   : > { %v1510_v50 = vpop.xlane.xlu0 %1509 }
 0x47f   : > { %4418 = vrcp.f32 %v1510_v50  ;;  %v4380_v50 = vld [vmem:[%s5671_s8 + $0x58] sm:$0xff]  }
 0x48c   : > { %v4419_v52 = vpop.eup %4418 }
 0x48d   : > { %v1512_v53 = vmul.f32 %v4419_v52, %v4417_v46  ;;  %v4378_v46 = vld [vmem:[%s5671_s8 + $0x68] sm:$0xff]   ;;  %v4381_v52 = vld [vmem:[%s5671_s8 + $0x50] sm:$0xff]  }
 0x48f   : > { %v1523_v54 = vrot.slane %v1512_v53, %v5161_v51  ;;  %v1516_v55 = vrot.slane %v1512_v53, %v5128_v14  ;;  %v4382_v53 = vld [vmem:[%s5671_s8 + $0x48] sm:$0xff]  }
 0x491   : > { %1525 = vbcast.lane.b32.xlu0 %v1523_v54, 256  ;;  %1518 = vbcast.lane.b32.xlu1 %v1516_v55, 256  ;;  %v4383_v54 = vld [vmem:[%s5671_s8 + $0x40] sm:$0xff]   ;;  %v4384_v55 = vld [vmem:[%s5669_s6 + $0xb8] sm:$0xff]  }
 0x503   : > { %v1526_v62 = vpop.permute.xlu0 %1525  ;;  %v1519_v1 = vpop.permute.xlu1 %1518 }
 0x504   : > { %v1530_v2 = vmul.f32 %v3786_v58, %v1526_v62  ;;  %v1529_v3 = vmul.f32 %v3785_v59, %v1519_v1  ;;  %v4387_v62 = vld [vmem:[%s5669_s6 + $0xa0] sm:$0xff]   ;;  %v4388_v1 = vld [vmem:[%s5669_s6 + $0x98] sm:$0xff]  }
 0x506   : > { %v1538_v4 = vsel %vm1088_vm3, %v1530_v2, 0.0  ;;  %v1531_v5 = vsel %vm1088_vm3, %v1529_v3, 0.0  ;;  %v4389_v2 = vld [vmem:[%s5669_s6 + $0x90] sm:$0xff]   ;;  %v4390_v3 = vld [vmem:[%s5669_s6 + $0x88] sm:$0xff]  }
 0x507   : > { %v1539_v6 = vrot.slane %v1538_v4, 4  ;;  %v1532_v8 = vrot.slane %v1531_v5, 4 }
 0x509   : > { %v1540_v9 = vadd.f32 %v1539_v6, %v1538_v4  ;;  %v1533_v10 = vadd.f32 %v1532_v8, %v1531_v5  ;;  %v4391_v4 = vld [vmem:[%s5669_s6 + $0x80] sm:$0xff]   ;;  %v865_v5 = vld [vmem:[#allocation11 + $0x8] sm:$0xf] }
 0x50a   : > { %v866_v6 = vld [vmem:[#allocation11 + $0xc] sm:$0xf]  ;;  %869 = vst.msk [vmem:[#allocation15 + $0x8] sm:$0xf] %vm858_vm2, %v865_v5 }
 0x50b   : > { %v1541_v11 = vrot.slane %v1540_v9, 2  ;;  %v1534_v13 = vrot.slane %v1533_v10, 2  ;;  %870 = vst.msk [vmem:[#allocation15 + $0xc] sm:$0xf] %vm858_vm2, %v866_v6 }
 0x50d   : > { %v1542_v15 = vadd.f32 %v1541_v11, %v1540_v9  ;;  %v1535_v18 = vadd.f32 %v1534_v13, %v1533_v10 }
 0x50f   : > { %v1543_v20 = vrot.slane %v1542_v15, 1  ;;  %v1536_v22 = vrot.slane %v1535_v18, 1 }
 0x511   : > { %v1544_v23 = vadd.f32 %v1543_v20, %v1542_v15  ;;  %v1537_v24 = vadd.f32 %v1536_v22, %v1535_v18 }
 0x513   : > { %v1546_v26 = vpack.c.bf16 %v1544_v23, %v1544_v23  ;;  %v1545_v27 = vpack.c.bf16 %v1537_v24, %v1537_v24 }
 0x515   : > { %v1554_v28 = vunpack.c.l.b16 %v1546_v26  ;;  %v1553_v30 = vunpack.c.l.b16 %v1545_v27 }
 0x517   : > { %v1555_v32 = vsel %vm1497_vm7, %v1554_v28, %v1553_v30 }
 0x518   : > { %v1556_v37 = vpack.c.b16 %v1555_v32, %v1555_v32 }
 0x51a   : > { %4023 = vmatmul.mubr.msk.bf16.vlgmr.msra.gmra.mxu0 %vm1088_vm3, %v1556_v37  ;;  %v2326_v37 = vld [vmem:[#allocation15 + $0x8] sm:$0x2] }
 0x51b   : > { %4027 = vmatpush3.bf16.msra.mxu0 %v4368_v35  ;;  %4042 = vmatprep.mubr.msk.bf16.mxu0 %vm4661_vm1, %v4660_v34 }
 0x51c   : > { %4028 = vmatprep.subr.bf16.mxu0 %v4660_v34 }
 0x51f   : > { %4029 = vmatpush3.bf16.msra.mxu0 %v4369_v38 }
 0x520   : > { %4030 = vmatprep.subr.bf16.mxu0 %v4660_v34 }
 0x523   : > { %4031 = vmatpush3.bf16.msra.mxu0 %v4370_v39 }
 0x524   : > { %4032 = vmatprep.subr.bf16.mxu0 %v4660_v34 }
 0x527   : > { %4033 = vmatpush3.bf16.msra.mxu0 %v4371_v40  ;;  %v2329_v40 = vld [vmem:[#allocation15 + $0xc] sm:$0x2] }
 0x528   : > { %4034 = vmatprep.subr.bf16.mxu0 %v4660_v34 }
 0x52b   : > { %4035 = vmatpush3.bf16.msra.mxu0 %v4372_v41 }
 0x52c   : > { %4036 = vmatprep.subr.bf16.mxu0 %v4660_v34 }
 0x52f   : > { %4037 = vmatpush3.bf16.msra.mxu0 %v4373_v12 }
 0x530   : > { %4038 = vmatprep.subr.bf16.mxu0 %v4660_v34 }
 0x533   : > { %4039 = vmatpush3.bf16.msra.mxu0 %v4374_v42 }
 0x534   : > { %4040 = vmatprep.subr.bf16.mxu0 %v4660_v34 }
 0x537   : > { %4041 = vmatpush3.bf16.msra.mxu0 %v4375_v43 }
 0x538   : > { %4085 = vmatprep.subr.bf16.mxu0 %v4660_v34 }
 0x53a   : > { %4043 = vmatmul.mubr.bf16.vlgmr.msra.gmra.mxu0 %v5002_v60 }
 0x53b   : > { %4086 = vmatpush3.bf16.msra.mxu0 %v4376_v44  ;;  %4101 = vmatprep.mubr.msk.bf16.mxu0 %vm4661_vm1, %v4660_v34 }
 0x53c   : > { %4087 = vmatprep.subr.bf16.mxu0 %v4660_v34 }
 0x53f   : > { %4088 = vmatpush3.bf16.msra.mxu0 %v4377_v45 }
 0x540   : > { %4089 = vmatprep.subr.bf16.mxu0 %v4660_v34 }
 0x543   : > { %4090 = vmatpush3.bf16.msra.mxu0 %v4378_v46 }
 0x544   : > { %4091 = vmatprep.subr.bf16.mxu0 %v4660_v34 }
 0x547   : > { %4092 = vmatpush3.bf16.msra.mxu0 %v4379_v47 }
 0x548   : > { %4093 = vmatprep.subr.bf16.mxu0 %v4660_v34 }
 0x54b   : > { %4094 = vmatpush3.bf16.msra.mxu0 %v4380_v50 }
 0x54c   : > { %4095 = vmatprep.subr.bf16.mxu0 %v4660_v34 }
 0x54f   : > { %4096 = vmatpush3.bf16.msra.mxu0 %v4381_v52 }
 0x550   : > { %4097 = vmatprep.subr.bf16.mxu0 %v4660_v34 }
 0x553   : > { %4098 = vmatpush3.bf16.msra.mxu0 %v4382_v53 }
 0x554   : > { %4099 = vmatprep.subr.bf16.mxu0 %v4660_v34 }
 0x557   : > { %4100 = vmatpush3.bf16.msra.mxu0 %v4383_v54 }
 0x558   : > { %4116 = vmatprep.subr.bf16.mxu0 %v4660_v34 }
 0x55a   : > { %4102 = vmatmul.mubr.bf16.vlgmr.msra.gmra.mxu0 %v5002_v60 }
 0x55b   : > { %4117 = vmatpush3.bf16.msra.mxu0 %v4384_v55  ;;  %4132 = vmatprep.mubr.msk.bf16.mxu0 %vm4661_vm1, %v4660_v34 }
 0x55c   : > { %4118 = vmatprep.subr.bf16.mxu0 %v4660_v34 }
 0x55f   : > { %4119 = vmatpush3.bf16.msra.mxu0 %v4385_v56 }
 0x560   : > { %4120 = vmatprep.subr.bf16.mxu0 %v4660_v34 }
 0x563   : > { %4121 = vmatpush3.bf16.msra.mxu0 %v4386_v16 }
 0x564   : > { %4122 = vmatprep.subr.bf16.mxu0 %v4660_v34 }
 0x567   : > { %4123 = vmatpush3.bf16.msra.mxu0 %v4387_v62 }
 0x568   : > { %4124 = vmatprep.subr.bf16.mxu0 %v4660_v34 }
 0x56b   : > { %4125 = vmatpush3.bf16.msra.mxu0 %v4388_v1 }
 0x56c   : > { %4126 = vmatprep.subr.bf16.mxu0 %v4660_v34 }
 0x56f   : > { %4127 = vmatpush3.bf16.msra.mxu0 %v4389_v2 }
 0x570   : > { %4128 = vmatprep.subr.bf16.mxu0 %v4660_v34 }
 0x573   : > { %4129 = vmatpush3.bf16.msra.mxu0 %v4390_v3 }
 0x574   : > { %4130 = vmatprep.subr.bf16.mxu0 %v4660_v34 }
 0x577   : > { %4131 = vmatpush3.bf16.msra.mxu0 %v4391_v4 }
 0x578   : > { %4175 = vmatprep.subr.mxu0 %v4660_v34 }
 0x57a   : > { %4133 = vmatmul.mubr.bf16.vlgmr.msra.gmra.mxu0 %v5002_v60 }
 0x57b   : > { %4176 = vmatpush3.msra.mxu0 %v5004_v61  ;;  %4183 = vmatprep.mubr.msk.f32.mxu0 %vm4661_vm1, %v4660_v34 }
 0x57c   : > { %4177 = vmatprep.subr.mxu0 %v4660_v34 }
 0x57d   : > { %4178 = vmatpush3.msra.mxu0 %v5013_v63 }
 0x57e   : > { %4179 = vmatprep.subr.mxu0 %v4660_v34 }
 0x57f   : > { %4180 = vmatpush3.msra.mxu0 %v5018_v0 }
 0x580   : > { %4181 = vmatprep.subr.mxu0 %v4660_v34 }
 0x581   : > { %4182 = vmatpush3.msra.mxu0 %v5060_v7 }
 0x582   : > { %4186 = vmatprep.subr.bf16.mxu0 %v4660_v34 }
 0x5da   : > { %v5302_v8 = vpop.f32.mrf.mxu0 }
 0x5dc   : > { %v4024_v9 = vpop.f32.mrf.mxu0 }
 0x5de   : > { %v1609_v10 = vpop.f32.mrf.mxu0 }
 0x5e0   : > { %v4025_v11 = vpop.f32.mrf.mxu0 }
 0x5fa   : > { %v1712_v13 = vpop.f32.mrf.mxu0 }
 0x5fb   : > { %4055 = vmatmul.mubr.msk.f32.vlgmr.msra.gmra.mxu1 %vm1088_vm3, %v1712_v13  ;;  %v1718_v50 = vmul.f32 %v5108_v48, %v1712_v13 }
 0x5fc   : > { %v4044_v15 = vpop.f32.mrf.mxu0  ;;  %4061 = vmatprep.mubr.msk.bf16.mxu1 %vm4661_vm1, %v4660_v34 }
 0x5fe   : > { %v1715_v18 = vpop.f32.mrf.mxu0 }
 0x600   : > { %v4045_v20 = vpop.f32.mrf.mxu0 }
 0x61a   : > { %v2164_v22 = vpop.f32.mrf.mxu0 }
 0x61b   : > { %v2289_v23 = vpack.c.bf16 %v2164_v22, %v2164_v22 }
 0x61c   : > { %v4103_v24 = vpop.f32.mrf.mxu0 }
 0x61d   : > { %v2297_v26 = vrot.slane %v2289_v23, %v5074_v19 }
 0x61e   : > { %v2167_v27 = vpop.f32.mrf.mxu0 }
 0x61f   : > { %v2304_v28 = vrot.slane %v2297_v26, %v5074_v19 }
 0x620   : > { %v4104_v30 = vpop.f32.mrf.mxu0 }
 0x621   : > { %v2306_v32 = vunpack.i.h.s16 %v2304_v28  ;;  %v3679_v35 = vpack.i.b16 %v2304_v28, %v2304_v28 }
 0x623   : > { %v2308_v38 = vpack.i.b16 %v2306_v32, %v2306_v32  ;;  %v2315_v39 = vrot.slane %v3679_v35, %v5084_v29 }
 0x625   : > { %v2322_v41 = vrot.slane %v2308_v38, %v5084_v29  ;;  %v2327_v12 = vsel %vm5090_vm6, %v2315_v39, %v2326_v37  ;;  %v4392_v37 = vld [vmem:[%s5672_s9 + $0x18] sm:$0xff]   ;;  %v4393_v38 = vld [vmem:[%s5672_s9 + $0x10] sm:$0xff]  }
 0x626   : > { %2328 = vst [vmem:[#allocation15 + $0x8] sm:$0x2] %v2327_v12  ;;  %4058 = vmatpush3.bf16.msra.mxu1 %v4392_v37 }
 0x627   : > { %v2330_v42 = vsel %vm5090_vm6, %v2322_v41, %v2329_v40  ;;  %4059 = vmatprep.subr.bf16.mxu1 %v4660_v34 }
 0x628   : > { %2331 = vst [vmem:[#allocation15 + $0xc] sm:$0x2] %v2330_v42 }
 0x62a   : > { %4060 = vmatpush3.bf16.msra.mxu1 %v4393_v38 }
 0x62b   : > { %4065 = vmatprep.subr.bf16.mxu1 %v4660_v34 }
 0x63a   : > { %v5315_v43 = vpop.f32.mrf.mxu0 }
 0x63c   : > { %v4134_v44 = vpop.f32.mrf.mxu0 }
 0x63e   : > { %v2438_v45 = vpop.f32.mrf.mxu0 }
 0x640   : > { %v4135_v46 = vpop.f32.mrf.mxu0 }
 0x6bb   : > { %v1788_v47 = vpop.f32.mrf.mxu1 }
 0x6bc   : > { %v1792_v52 = vmul.f32 %v5113_v49, %v1788_v47 }
 0x6bd   : > { %v4056_v53 = vpop.f32.mrf.mxu1 }
 0x6be   : > { %v1793_v54 = vadd.f32 %v1792_v52, %v1718_v50 }
 0x6c0   : > { %v1801_v55 = vrot.slane %v1793_v54, %v5074_v19 }
 0x6c2   : > { %v1802_v56 = vcombine.high %v1801_v55, %v1801_v55  ;;  %v1809_v16 = vrot.slane %v1801_v55, %v5074_v19 }
 0x6c4   : > { %v1820_v62 = vrot.slane %v1809_v16, %v5128_v14  ;;  %v1816_v1 = vrot.slane %v1802_v56, %v5074_v19 }
 0x6c6   : > { %v1827_v2 = vmul.f32 %v3781_v21, %v1820_v62  ;;  %v1824_v3 = vrot.slane %v1816_v1, %v5128_v14 }
 0x6c8   : > { %v1829_v4 = vsel %vm1088_vm3, %v1827_v2, 0.0  ;;  %v1828_v5 = vmul.f32 %v3782_v25, %v1824_v3 }
 0x6c9   : > { %1830 = vadd.xlane.f32.xlu1 %v1829_v4  ;;  %v4394_v4 = vld [vmem:[%s5670_s7 + $0x78] sm:$0xff]  }
 0x6ca   : > { %v1832_v6 = vsel %vm1088_vm3, %v1828_v5, 0.0 }
 0x6cb   : > { %1833 = vadd.xlane.f32.xlu0 %v1832_v6  ;;  %v4395_v6 = vld [vmem:[%s5670_s7 + $0x70] sm:$0xff]  }
 0x752   : > { %v1831_v9 = vpop.xlane.xlu1 %1830 }
 0x753   : > { %v1835_v10 = vmul.f32 0.17677669, %v1831_v9  ;;  %v4396_v9 = vld [vmem:[%s5670_s7 + $0x68] sm:$0xff]  }
 0x754   : > { %v1834_v11 = vpop.xlane.xlu0 %1833 }
 0x755   : > { %v1836_v13 = vmul.f32 0.17677669, %v1834_v11  ;;  %v1842_v15 = vrot.slane %v1835_v10, %v5150_v33  ;;  %v4397_v10 = vld [vmem:[%s5670_s7 + $0x60] sm:$0xff]   ;;  %v4398_v11 = vld [vmem:[%s5670_s7 + $0x58] sm:$0xff]  }
 0x757   : > { %v1846_v18 = vrot.slane %v1836_v13, %v5150_v33  ;;  %v4399_v13 = vld [vmem:[%s5670_s7 + $0x50] sm:$0xff]  }
 0x759   : > { %v1847_v21 = vsel %vm1497_vm7, %v1846_v18, %v1842_v15  ;;  %v4400_v15 = vld [vmem:[%s5670_s7 + $0x48] sm:$0xff]   ;;  %v4401_v18 = vld [vmem:[%s5670_s7 + $0x40] sm:$0xff]  }
 0x75a   : > { %v1849_v20 = vsel %vm1486_vm8, %v1847_v21, -1e+30  ;;  %v856_v21 = vld [vmem:[#allocation9 + $0x8] sm:$0xf] }
 0x75b   : > { %v1850_v17 = vsel %vm1501_vm9, %v1849_v20, -inf  ;;  %861 = vst.msk [vmem:[#allocation13 + $0x8] sm:$0xf] %vm858_vm2, %v856_v21 }
 0x75c   : > { %1851 = vmax.xlane.f32.xlu1 %v1850_v17  ;;  %v4434_v17 = vld [vmem:[%s5694_s22] sm:$0x3] }
 0x7e5   : > { %v1852_v25 = vpop.xlane.xlu1 %1851 }
 0x7e6   : > { %v1853_v22 = vsub.f32 %v1849_v20, %v1852_v25  ;;  %v857_v20 = vld [vmem:[#allocation9 + $0xc] sm:$0xf]  ;;  %v1612_v25 = vadd.f32 %v4434_v17, %v5302_v8 }
 0x7e7   : > { %862 = vst.msk [vmem:[#allocation13 + $0xc] sm:$0xf] %vm858_vm2, %v857_v20 }
 0x7e8   : > { %v1854_v23 = vmul.f32 1.442695, %v1853_v22 }
 0x7ea   : > { %4420 = vpow2.f32 %v1854_v23 }
 0x7f7   : > { %v4421_v24 = vpop.eup %4420 }
 0x7f8   : > { %v1856_v26 = vsel %vm1501_vm9, %v4421_v24, 0.0 }
 0x7f9   : > { %1857 = vadd.xlane.f32.xlu0 %v1856_v26 }
 0x882   : > { %v1858_v27 = vpop.xlane.xlu0 %1857 }
 0x883   : > { %4422 = vrcp.f32 %v1858_v27 }
 0x890   : > { %v4423_v28 = vpop.eup %4422 }
 0x891   : > { %v1860_v30 = vmul.f32 %v4423_v28, %v4421_v24 }
 0x893   : > { %v1871_v32 = vrot.slane %v1860_v30, %v5161_v51  ;;  %v1864_v35 = vrot.slane %v1860_v30, %v5128_v14 }
 0x895   : > { %1873 = vbcast.lane.b32.xlu0 %v1871_v32, 256  ;;  %1866 = vbcast.lane.b32.xlu1 %v1864_v35, 256 }
 0x907   : > { %v1874_v39 = vpop.permute.xlu0 %1873  ;;  %v1867_v40 = vpop.permute.xlu1 %1866 }
 0x908   : > { %v1876_v41 = vmul.f32 %v3786_v58, %v1874_v39  ;;  %v1875_v12 = vmul.f32 %v3785_v59, %v1867_v40 }
 0x90a   : > { %v1884_v42 = vsel %vm1088_vm3, %v1876_v41, 0.0  ;;  %v1877_v44 = vsel %vm1088_vm3, %v1875_v12, 0.0 }
 0x90b   : > { %v1885_v45 = vrot.slane %v1884_v42, 4  ;;  %v1878_v46 = vrot.slane %v1877_v44, 4 }
 0x90d   : > { %v1886_v47 = vadd.f32 %v1885_v45, %v1884_v42  ;;  %v1879_v50 = vadd.f32 %v1878_v46, %v1877_v44 }
 0x90f   : > { %v1887_v52 = vrot.slane %v1886_v47, 2  ;;  %v1880_v53 = vrot.slane %v1879_v50, 2 }
 0x911   : > { %v1888_v54 = vadd.f32 %v1887_v52, %v1886_v47  ;;  %v1881_v55 = vadd.f32 %v1880_v53, %v1879_v50  ;;  %v2283_v47 = vld [vmem:[#allocation13 + $0x8] sm:$0x2]  ;;  %v2286_v53 = vld [vmem:[#allocation13 + $0xc] sm:$0x2] }
 0x913   : > { %v1889_v56 = vrot.slane %v1888_v54, 1  ;;  %v1882_v16 = vrot.slane %v1881_v55, 1 }
 0x915   : > { %v1890_v62 = vadd.f32 %v1889_v56, %v1888_v54  ;;  %v1883_v1 = vadd.f32 %v1882_v16, %v1881_v55 }
 0x917   : > { %v1892_v58 = vpack.c.bf16 %v1890_v62, %v1890_v62  ;;  %v1891_v2 = vpack.c.bf16 %v1883_v1, %v1883_v1 }
 0x919   : > { %v1901_v57 = vunpack.c.l.b16 %v1892_v58  ;;  %v1900_v59 = vunpack.c.l.b16 %v1891_v2 }
 0x91b   : > { %v1902_v3 = vsel %vm1497_vm7, %v1901_v57, %v1900_v59 }
 0x91c   : > { %v1903_v5 = vpack.c.b16 %v1902_v3, %v1902_v3 }
 0x91e   : > { %4062 = vmatmul.mubr.msk.bf16.vlgmr.msra.gmra.mxu1 %vm1088_vm3, %v1903_v5 }
 0x91f   : > { %4066 = vmatpush3.bf16.msra.mxu1 %v4394_v4  ;;  %4081 = vmatprep.mubr.msk.bf16.mxu1 %vm4661_vm1, %v4660_v34 }
 0x920   : > { %4067 = vmatprep.subr.bf16.mxu1 %v4660_v34 }
 0x923   : > { %4068 = vmatpush3.bf16.msra.mxu1 %v4395_v6 }
 0x924   : > { %4069 = vmatprep.subr.bf16.mxu1 %v4660_v34 }
 0x927   : > { %4070 = vmatpush3.bf16.msra.mxu1 %v4396_v9 }
 0x928   : > { %4071 = vmatprep.subr.bf16.mxu1 %v4660_v34 }
 0x92b   : > { %4072 = vmatpush3.bf16.msra.mxu1 %v4397_v10 }
 0x92c   : > { %4073 = vmatprep.subr.bf16.mxu1 %v4660_v34 }
 0x92f   : > { %4074 = vmatpush3.bf16.msra.mxu1 %v4398_v11 }
 0x930   : > { %4075 = vmatprep.subr.bf16.mxu1 %v4660_v34 }
 0x933   : > { %4076 = vmatpush3.bf16.msra.mxu1 %v4399_v13 }
 0x934   : > { %4077 = vmatprep.subr.bf16.mxu1 %v4660_v34 }
 0x937   : > { %4078 = vmatpush3.bf16.msra.mxu1 %v4400_v15 }
 0x938   : > { %4079 = vmatprep.subr.bf16.mxu1 %v4660_v34 }
 0x93b   : > { %4080 = vmatpush3.bf16.msra.mxu1 %v4401_v18 }
 0x93c   : > { %4105 = vmatprep.subr.mxu1 %v4660_v34 }
 0x93e   : > { %4082 = vmatmul.mubr.bf16.vlgmr.msra.gmra.mxu1 %v5002_v60 }
 0x93f   : > { %4106 = vmatpush3.msra.mxu1 %v5004_v61  ;;  %4113 = vmatprep.mubr.msk.f32.mxu1 %vm4661_vm1, %v4660_v34 }
 0x940   : > { %4107 = vmatprep.subr.mxu1 %v4660_v34 }
 0x941   : > { %4108 = vmatpush3.msra.mxu1 %v5013_v63 }
 0x942   : > { %4109 = vmatprep.subr.mxu1 %v4660_v34 }
 0x943   : > { %4110 = vmatpush3.msra.mxu1 %v5018_v0 }
 0x944   : > { %4111 = vmatprep.subr.mxu1 %v4660_v34 }
 0x945   : > { %4112 = vmatpush3.msra.mxu1 %v5060_v7 }
 0x946   : > { %4136 = vmatprep.subr.mxu1 %v4660_v34 }
 0x9de   : > { %v1953_v22 = vpop.f32.mrf.mxu1 }
 0x9df   : > { %v5406_v23 = vadd.f32 %v1953_v22, %v1612_v25 }
 0x9e0   : > { %v4063_v24 = vpop.f32.mrf.mxu1 }
 0x9e2   : > { %v1956_v26 = vpop.f32.mrf.mxu1 }
 0x9e4   : > { %v4064_v27 = vpop.f32.mrf.mxu1 }
 0x9fe   : > { %v2059_v28 = vpop.f32.mrf.mxu1 }
 0x9ff   : > { %4114 = vmatmul.mubr.msk.f32.vlgmr.msra.gmra.mxu1 %vm1088_vm3, %v2059_v28 }
 0xa00   : > { %4137 = vmatpush3.msra.mxu1 %v5004_v61  ;;  %v4083_v30 = vpop.f32.mrf.mxu1  ;;  %4144 = vmatprep.mubr.msk.f32.mxu1 %vm4661_vm1, %v4660_v34 }
 0xa01   : > { %4138 = vmatprep.subr.mxu1 %v4660_v34 }
 0xa02   : > { %4139 = vmatpush3.msra.mxu1 %v5013_v63  ;;  %v2062_v8 = vpop.f32.mrf.mxu1  ;;  %v2170_v63 = vmul.f32 %v5108_v48, %v2059_v28 }
 0xa03   : > { %4140 = vmatprep.subr.mxu1 %v4660_v34 }
 0xa04   : > { %4141 = vmatpush3.msra.mxu1 %v5018_v0  ;;  %v4084_v32 = vpop.f32.mrf.mxu1 }
 0xa05   : > { %4142 = vmatprep.subr.mxu1 %v4660_v34 }
 0xa06   : > { %4143 = vmatpush3.msra.mxu1 %v5060_v7  ;;  %v2441_v7 = vmul.f32 %v5108_v48, %v5315_v43 }
 0xa07   : > { %4145 = vmatmul.mubr.msk.f32.vlgmr.msra.gmra.mxu1 %vm1088_vm3, %v5315_v43  ;;  %4147 = vmatprep.subr.bf16.mxu1 %v4660_v34 }
 0xa08   : > { %4151 = vmatprep.mubr.msk.bf16.mxu1 %vm4661_vm1, %v4660_v34 }
 0xabf   : > { %v2240_v61 = vpop.f32.mrf.mxu1 }
 0xac0   : > { %v2244_v35 = vmul.f32 %v5113_v49, %v2240_v61  ;;  %v4402_v61 = vld [vmem:[%s5672_s9 + $0x28] sm:$0xff]  }
 0xac1   : > { %v4115_v37 = vpop.f32.mrf.mxu1  ;;  %4148 = vmatpush3.bf16.msra.mxu1 %v4402_v61 }
 0xac2   : > { %v2245_v0 = vadd.f32 %v2244_v35, %v2170_v63  ;;  %4149 = vmatprep.subr.bf16.mxu1 %v4660_v34  ;;  %v4403_v63 = vld [vmem:[%s5672_s9 + $0x20] sm:$0xff]  }
 0xac3   : > { %v5468_v35 = vld [vmem:[#allocation15 + $0x8] sm:$0xff]  }
 0xac4   : > { %v2246_v38 = vpack.c.bf16 %v2245_v0, %v2245_v0  ;;  %v3794_v37 = vunpack.c.h.bf16 %v5468_v35  ;;  %v3793_v0 = vunpack.c.l.bf16 %v5468_v35 }
 0xac5   : > { %4150 = vmatpush3.bf16.msra.mxu1 %v4403_v63 }
 0xac6   : > { %v2254_v39 = vrot.slane %v2246_v38, %v5074_v19  ;;  %4155 = vmatprep.subr.bf16.mxu1 %v4660_v34 }
 0xac7   : > { %v2511_v40 = vpop.f32.mrf.mxu1 }
 0xac8   : > { %v2261_v41 = vrot.slane %v2254_v39, %v5074_v19  ;;  %v2515_v12 = vmul.f32 %v5113_v49, %v2511_v40 }
 0xac9   : > { %v4146_v42 = vpop.f32.mrf.mxu1 }
 0xaca   : > { %v2263_v44 = vunpack.i.h.s16 %v2261_v41  ;;  %v3678_v45 = vpack.i.b16 %v2261_v41, %v2261_v41  ;;  %v2516_v46 = vadd.f32 %v2515_v12, %v2441_v7 }
 0xacc   : > { %v2265_v50 = vpack.i.b16 %v2263_v44, %v2263_v44  ;;  %v2272_v52 = vrot.slane %v3678_v45, %v5084_v29  ;;  %v2524_v54 = vrot.slane %v2516_v46, %v5074_v19 }
 0xace   : > { %v2279_v55 = vrot.slane %v2265_v50, %v5084_v29  ;;  %v2284_v43 = vsel %vm5090_vm6, %v2272_v52, %v2283_v47  ;;  %v2525_v16 = vcombine.high %v2524_v54, %v2524_v54  ;;  %v2532_v62 = vrot.slane %v2524_v54, %v5074_v19 }
 0xacf   : > { %2285 = vst [vmem:[#allocation13 + $0x8] sm:$0x2] %v2284_v43 }
 0xad0   : > { %v2287_v56 = vsel %vm5090_vm6, %v2279_v55, %v2286_v53  ;;  %v2539_v1 = vrot.slane %v2525_v16, %v5074_v19  ;;  %v2545_v57 = vrot.slane %v2532_v62, %v5128_v14 }
 0xad1   : > { %2288 = vst [vmem:[#allocation13 + $0xc] sm:$0x2] %v2287_v56 }
 0xad2   : > { %v2549_v59 = vrot.slane %v2539_v1, %v5128_v14 }
 0xad8   : > { %v5439_v58 = vld [vmem:[#allocation13 + $0x8] sm:$0xff]  }
 0xad9   : > { %v3789_v2 = vunpack.c.l.bf16 %v5439_v58  ;;  %v3790_v29 = vunpack.c.h.bf16 %v5439_v58 }
 0xadb   : > { %v2552_v36 = vmul.f32 %v3789_v2, %v2545_v57  ;;  %v2553_v3 = vmul.f32 %v3790_v29, %v2549_v59 }
 0xadd   : > { %v2554_v4 = vsel %vm1088_vm3, %v2552_v36, 0.0  ;;  %v2557_v5 = vsel %vm1088_vm3, %v2553_v3, 0.0  ;;  %v4404_v36 = vld [vmem:[%s5669_s6 + $0xf8] sm:$0xff]  }
 0xade   : > { %2555 = vadd.xlane.f32.xlu1 %v2554_v4  ;;  %2558 = vadd.xlane.f32.xlu0 %v2557_v5  ;;  %v4405_v4 = vld [vmem:[%s5669_s6 + $0xf0] sm:$0xff]   ;;  %v4406_v5 = vld [vmem:[%s5669_s6 + $0xe8] sm:$0xff]  }
 0xb67   : > { %v2556_v6 = vpop.xlane.xlu1 %2555  ;;  %v2559_v9 = vpop.xlane.xlu0 %2558 }
 0xb68   : > { %v2560_v10 = vmul.f32 0.17677669, %v2556_v6  ;;  %v2561_v11 = vmul.f32 0.17677669, %v2559_v9  ;;  %v4407_v6 = vld [vmem:[%s5669_s6 + $0xe0] sm:$0xff]   ;;  %v4408_v9 = vld [vmem:[%s5669_s6 + $0xd8] sm:$0xff]  }
 0xb6a   : > { %v2567_v13 = vrot.slane %v2560_v10, %v5150_v33  ;;  %v2571_v15 = vrot.slane %v2561_v11, %v5150_v33  ;;  %v4409_v10 = vld [vmem:[%s5669_s6 + $0xd0] sm:$0xff]   ;;  %v4410_v11 = vld [vmem:[%s5669_s6 + $0xc8] sm:$0xff]  }
 0xb6c   : > { %v2572_v18 = vsel %vm1497_vm7, %v2571_v15, %v2567_v13  ;;  %v4411_v13 = vld [vmem:[%s5669_s6 + $0xc0] sm:$0xff]  }
 0xb6d   : > { %v2574_v21 = vsel %vm1486_vm8, %v2572_v18, -1e+30 }
 0xb6e   : > { %v2575_v20 = vsel %vm1501_vm9, %v2574_v21, -inf }
 0xb6f   : > { %2576 = vmax.xlane.f32.xlu1 %v2575_v20 }
 0xbf8   : > { %v2577_v17 = vpop.xlane.xlu1 %2576 }
 0xbf9   : > { %v2578_v25 = vsub.f32 %v2574_v21, %v2577_v17 }
 0xbfb   : > { %v2579_v22 = vmul.f32 1.442695, %v2578_v25 }
 0xbfd   : > { %4424 = vpow2.f32 %v2579_v22 }
 0xc0a   : > { %v4425_v24 = vpop.eup %4424 }
 0xc0b   : > { %v2581_v26 = vsel %vm1501_vm9, %v4425_v24, 0.0 }
 0xc0c   : > { %2582 = vadd.xlane.f32.xlu0 %v2581_v26 }
 0xc95   : > { %v2583_v27 = vpop.xlane.xlu0 %2582 }
 0xc96   : > { %4426 = vrcp.f32 %v2583_v27 }
 0xca3   : > { %v4427_v28 = vpop.eup %4426 }
 0xca4   : > { %v2585_v30 = vmul.f32 %v4427_v28, %v4425_v24 }
 0xca6   : > { %v2596_v8 = vrot.slane %v2585_v30, %v5161_v51  ;;  %v2589_v32 = vrot.slane %v2585_v30, %v5128_v14 }
 0xca8   : > { %2598 = vbcast.lane.b32.xlu0 %v2596_v8, 256  ;;  %2591 = vbcast.lane.b32.xlu1 %v2589_v32, 256 }
 0xd1a   : > { %v2599_v38 = vpop.permute.xlu0 %2598  ;;  %v2592_v39 = vpop.permute.xlu1 %2591 }
 0xd1b   : > { %v2603_v40 = vmul.f32 %v3794_v37, %v2599_v38  ;;  %v2602_v7 = vmul.f32 %v3793_v0, %v2592_v39 }
 0xd1d   : > { %v2611_v41 = vsel %vm1088_vm3, %v2603_v40, 0.0  ;;  %v2604_v12 = vsel %vm1088_vm3, %v2602_v7, 0.0 }
 0xd1e   : > { %v2612_v42 = vrot.slane %v2611_v41, 4  ;;  %v2605_v44 = vrot.slane %v2604_v12, 4 }
 0xd20   : > { %v2613_v45 = vadd.f32 %v2612_v42, %v2611_v41  ;;  %v2606_v46 = vadd.f32 %v2605_v44, %v2604_v12 }
 0xd22   : > { %v2614_v47 = vrot.slane %v2613_v45, 2  ;;  %v2607_v50 = vrot.slane %v2606_v46, 2 }
 0xd24   : > { %v2615_v52 = vadd.f32 %v2614_v47, %v2613_v45  ;;  %v2608_v53 = vadd.f32 %v2607_v50, %v2606_v46 }
 0xd26   : > { %v2616_v54 = vrot.slane %v2615_v52, 1  ;;  %v2609_v55 = vrot.slane %v2608_v53, 1 }
 0xd28   : > { %v2617_v43 = vadd.f32 %v2616_v54, %v2615_v52  ;;  %v2610_v56 = vadd.f32 %v2609_v55, %v2608_v53 }
 0xd2a   : > { %v2619_v16 = vpack.c.bf16 %v2617_v43, %v2617_v43  ;;  %v2618_v62 = vpack.c.bf16 %v2610_v56, %v2610_v56  ;;  %v4412_v56 = vld [vmem:[%s5672_s9 + $0x38] sm:$0xff]  }
 0xd2c   : > { %v2628_v1 = vunpack.c.l.b16 %v2619_v16  ;;  %v2627_v57 = vunpack.c.l.b16 %v2618_v62  ;;  %v4413_v16 = vld [vmem:[%s5672_s9 + $0x30] sm:$0xff]  }
 0xd2e   : > { %v2629_v59 = vsel %vm1497_vm7, %v2628_v1, %v2627_v57 }
 0xd2f   : > { %v2630_v3 = vpack.c.b16 %v2629_v59, %v2629_v59 }
 0xd31   : > { %4152 = vmatmul.mubr.msk.bf16.vlgmr.msra.gmra.mxu1 %vm1088_vm3, %v2630_v3 }
 0xd32   : > { %4156 = vmatpush3.bf16.msra.mxu1 %v4404_v36  ;;  %4171 = vmatprep.mubr.msk.bf16.mxu1 %vm4661_vm1, %v4660_v34 }
 0xd33   : > { %4157 = vmatprep.subr.bf16.mxu1 %v4660_v34 }
 0xd36   : > { %4158 = vmatpush3.bf16.msra.mxu1 %v4405_v4 }
 0xd37   : > { %4159 = vmatprep.subr.bf16.mxu1 %v4660_v34 }
 0xd3a   : > { %4160 = vmatpush3.bf16.msra.mxu1 %v4406_v5 }
 0xd3b   : > { %4161 = vmatprep.subr.bf16.mxu1 %v4660_v34 }
 0xd3e   : > { %4162 = vmatpush3.bf16.msra.mxu1 %v4407_v6 }
 0xd3f   : > { %4163 = vmatprep.subr.bf16.mxu1 %v4660_v34 }
 0xd42   : > { %4164 = vmatpush3.bf16.msra.mxu1 %v4408_v9 }
 0xd43   : > { %4165 = vmatprep.subr.bf16.mxu1 %v4660_v34 }
 0xd46   : > { %4166 = vmatpush3.bf16.msra.mxu1 %v4409_v10 }
 0xd47   : > { %4167 = vmatprep.subr.bf16.mxu1 %v4660_v34 }
 0xd4a   : > { %4168 = vmatpush3.bf16.msra.mxu1 %v4410_v11 }
 0xd4b   : > { %4169 = vmatprep.subr.bf16.mxu1 %v4660_v34 }
 0xd4e   : > { %4170 = vmatpush3.bf16.msra.mxu1 %v4411_v13 }
 0xd51   : > { %4172 = vmatmul.mubr.bf16.vlgmr.msra.gmra.mxu1 %v5002_v60 }
 0xdf1   : > { %v2680_v15 = vpop.f32.mrf.mxu1 }
 0xdf2   : > { %v5515_v18 = vadd.f32 %v2680_v15, %v5406_v23 }
 0xdf3   : > { %v4153_v21 = vpop.f32.mrf.mxu1 }
 0xdf5   : > { %v2683_v20 = vpop.f32.mrf.mxu1 }
 0xdf7   : > { %v4154_v17 = vpop.f32.mrf.mxu1 }
 0xe11   : > { %v2786_v25 = vpop.f32.mrf.mxu1 }
 0xe12   : > { %4184 = vmatmul.mubr.msk.f32.vlgmr.msra.gmra.mxu0 %vm1088_vm3, %v2786_v25  ;;  %v2792_v28 = vmul.f32 %v5108_v48, %v2786_v25 }
 0xe13   : > { %v4173_v22 = vpop.f32.mrf.mxu1  ;;  %4190 = vmatprep.mubr.msk.bf16.mxu0 %vm4661_vm1, %v4660_v34  ;;  %4187 = vmatpush3.bf16.msra.mxu0 %v4412_v56 }
 0xe14   : > { %4188 = vmatprep.subr.bf16.mxu0 %v4660_v34 }
 0xe15   : > { %v2789_v24 = vpop.f32.mrf.mxu1 }
 0xe17   : > { %v4174_v26 = vpop.f32.mrf.mxu1  ;;  %4189 = vmatpush3.bf16.msra.mxu0 %v4413_v16 }
 0xed2   : > { %v2862_v27 = vpop.f32.mrf.mxu0 }
 0xed3   : > { %v2866_v60 = vmul.f32 %v5113_v49, %v2862_v27 }
 0xed4   : > { %v4185_v30 = vpop.f32.mrf.mxu0 }
 0xed5   : > { %v2867_v23 = vadd.f32 %v2866_v60, %v2792_v28 }
 0xed7   : > { %v2875_v8 = vrot.slane %v2867_v23, %v5074_v19 }
 0xed9   : > { %v2876_v32 = vcombine.high %v2875_v8, %v2875_v8  ;;  %v2883_v61 = vrot.slane %v2875_v8, %v5074_v19 }
 0xedb   : > { %v2894_v63 = vrot.slane %v2883_v61, %v5128_v14  ;;  %v2890_v38 = vrot.slane %v2876_v32, %v5074_v19 }
 0xedd   : > { %v2901_v39 = vmul.f32 %v3789_v2, %v2894_v63  ;;  %v2898_v40 = vrot.slane %v2890_v38, %v5128_v14  ;;  %v3744_v63 = vld [vmem:[%s5665_s2] ss:$0 sm:$0xff] }
 0xedf   : > { %v2903_v48 = vsel %vm1088_vm3, %v2901_v39, 0.0  ;;  %v2902_v49 = vmul.f32 %v3790_v29, %v2898_v40 }
 0xee0   : > { %2904 = vadd.xlane.f32.xlu1 %v2903_v48 }
 0xee1   : > { %v2906_v7 = vsel %vm1088_vm3, %v2902_v49, 0.0 }
 0xee2   : > { %2907 = vadd.xlane.f32.xlu0 %v2906_v7 }
 0xf69   : > { %v2905_v41 = vpop.xlane.xlu1 %2904 }
 0xf6a   : > { %v2909_v12 = vmul.f32 0.17677669, %v2905_v41 }
 0xf6b   : > { %v2908_v42 = vpop.xlane.xlu0 %2907 }
 0xf6c   : > { %v2910_v44 = vmul.f32 0.17677669, %v2908_v42  ;;  %v2916_v19 = vrot.slane %v2909_v12, %v5150_v33 }
 0xf6e   : > { %v2920_v45 = vrot.slane %v2910_v44, %v5150_v33 }
 0xf70   : > { %v2921_v2 = vsel %vm1497_vm7, %v2920_v45, %v2916_v19 }
 0xf71   : > { %v2923_v46 = vsel %vm1486_vm8, %v2921_v2, -1e+30 }
 0xf72   : > { %v2924_v58 = vsel %vm1501_vm9, %v2923_v46, -inf }
 0xf73   : > { %2925 = vmax.xlane.f32.xlu1 %v2924_v58 }
 0xffc   : > { %v2926_v29 = vpop.xlane.xlu1 %2925 }
 0xffd   : > { %v2927_v47 = vsub.f32 %v2923_v46, %v2926_v29 }
 0xfff   : > { %v2928_v50 = vmul.f32 1.442695, %v2927_v47 }
0x1001   : > { %4428 = vpow2.f32 %v2928_v50 }
0x100e   : > { %v4429_v52 = vpop.eup %4428 }
0x100f   : > { %v2930_v53 = vsel %vm1501_vm9, %v4429_v52, 0.0 }
0x1010   : > { %2931 = vadd.xlane.f32.xlu0 %v2930_v53 }
0x1099   : > { %v2932_v54 = vpop.xlane.xlu0 %2931 }
0x109a   : > { %4430 = vrcp.f32 %v2932_v54 }
0x10a7   : > { %v4431_v55 = vpop.eup %4430 }
0x10a8   : > { %v2934_v33 = vmul.f32 %v4431_v55, %v4429_v52 }
0x10aa   : > { %v2945_v43 = vrot.slane %v2934_v33, %v5161_v51  ;;  %v2938_v31 = vrot.slane %v2934_v33, %v5128_v14 }
0x10ac   : > { %2947 = vbcast.lane.b32.xlu0 %v2945_v43, 256  ;;  %2940 = vbcast.lane.b32.xlu1 %v2938_v31, 256 }
0x111e   : > { %v2948_v62 = vpop.permute.xlu0 %2947  ;;  %v2941_v1 = vpop.permute.xlu1 %2940 }
0x111f   : > { %v2950_v51 = vmul.f32 %v3794_v37, %v2948_v62  ;;  %v2949_v14 = vmul.f32 %v3793_v0, %v2941_v1 }
0x1121   : > { %v2958_v57 = vsel %vm1088_vm3, %v2950_v51, 0.0  ;;  %v2951_v59 = vsel %vm1088_vm3, %v2949_v14, 0.0 }
0x1122   : > { %v2959_v36 = vrot.slane %v2958_v57, 4  ;;  %v2952_v3 = vrot.slane %v2951_v59, 4 }
0x1124   : > { %v2960_v34 = vadd.f32 %v2959_v36, %v2958_v57  ;;  %v2953_v4 = vadd.f32 %v2952_v3, %v2951_v59 }
0x1126   : > { %v2961_v5 = vrot.slane %v2960_v34, 2  ;;  %v2954_v6 = vrot.slane %v2953_v4, 2 }
0x1128   : > { %v2962_v9 = vadd.f32 %v2961_v5, %v2960_v34  ;;  %v2955_v10 = vadd.f32 %v2954_v6, %v2953_v4 }
0x112a   : > { %v2963_v11 = vrot.slane %v2962_v9, 1  ;;  %v2956_v13 = vrot.slane %v2955_v10, 1 }
0x112c   : > { %v2964_v15 = vadd.f32 %v2963_v11, %v2962_v9  ;;  %v2957_v21 = vadd.f32 %v2956_v13, %v2955_v10 }
0x112e   : > { %v2966_v37 = vpack.c.bf16 %v2964_v15, %v2964_v15  ;;  %v2965_v20 = vpack.c.bf16 %v2957_v21, %v2957_v21 }
0x1130   : > { %v2975_v35 = vunpack.c.l.b16 %v2966_v37  ;;  %v2974_v0 = vunpack.c.l.b16 %v2965_v20 }
0x1132   : > { %v2976_v17 = vsel %vm1497_vm7, %v2975_v35, %v2974_v0 }
0x1133   : > { %v2977_v25 = vpack.c.b16 %v2976_v17, %v2976_v17 }
0x1135   : > { %4191 = vmatmul.mubr.msk.bf16.vlgmr.msra.gmra.mxu0 %vm1088_vm3, %v2977_v25 }
0x11f5   : > { %v3027_v22 = vpop.f32.mrf.mxu0 }
0x11f6   : > { %v3033_v24 = vadd.f32 %v3027_v22, %v5515_v18 }
0x11f7   : > { %v4192_v26 = vpop.f32.mrf.mxu0 }
0x11f8   : > { %3052 = vst [vmem:[#allocation3] sm:$0x3] %v3033_v24  ;;  %v3034_v27 = vmul.f32 %v3033_v24, %v3033_v24 }
0x11f9   : > { %v3030_v28 = vpop.f32.mrf.mxu0 }
0x11fa   : > { %v3035_v60 = vsel %vm830_vm0, %v3034_v27, 0.0 }
0x11fb   : > { %3036 = vadd.xlane.f32.xlu1 %v3035_v60  ;;  %v4193_v30 = vpop.f32.mrf.mxu0 }
0x1284   : > { %v3037_v23 = vpop.xlane.xlu1 %3036 }
0x1285   : > { %v3038_v8 = vmul.f32 0.0078125, %v3037_v23 }
0x1287   : > { %v3040_v32 = vadd.f32 1e-05, %v3038_v8 }
0x1289   : > { %4432 = vrsqrt.f32 %v3040_v32 }
0x1296   : > { %v4433_v61 = vpop.eup %4432 }
0x1297   : > { %v3042_v38 = vmul.f32 %v4433_v61, %v3033_v24 }
0x1299   : > { %v3049_v39 = vmul.f32 %v3744_v63, %v3042_v38 }
0x129b   : > { %v3050_v18 = vpack.c.bf16 %v3049_v39, %v3049_v39 }
0x129d   : > { %3051 = vst [vmem:[#allocation2] sm:$0x1] %v3050_v18 }
0x129e PF: > { %v4435_v40 = vld [vmem:[%s4901_s23 + $0x38] sm:$0xff]   ;;  %v4664_v48 = vmov 0.0   ;;  %v4436_v49 = vld [vmem:[%s4901_s23 + $0x30] sm:$0xff]   ;;  %vm4665_vm10 = vmmov 0   ;;  %v4437_v7 = vld [vmem:[%s4901_s23 + $0x28] sm:$0xff]   ;;  %p3770_p6 = scmp.ne.s32.totalorder %s4777_s27, 2 }
0x129f   : > { %4194 = vmatprep.subr.bf16.mxu0 %v4664_v48  ;;  %4214 = vmatprep.subr.bf16.mxu1 %v4664_v48  ;;  %v4443_v41 = vld [vmem:[%s4903_s29 + $0x38] sm:$0xff]   ;;  %v4438_v12 = vld [vmem:[%s4901_s23 + $0x20] sm:$0xff]   ;;  %v4444_v42 = vld [vmem:[%s4903_s29 + $0x30] sm:$0xff]  }
0x12a0   : > { %4195 = vmatpush3.bf16.msra.mxu0 %v4435_v40  ;;  %4210 = vmatprep.mubr.msk.bf16.mxu0 %vm4665_vm10, %v4664_v48  ;;  %v4439_v44 = vld [vmem:[%s4901_s23 + $0x18] sm:$0xff]   ;;  %v4445_v19 = vld [vmem:[%s4903_s29 + $0x28] sm:$0xff]   ;;  %v4440_v45 = vld [vmem:[%s4901_s23 + $0x10] sm:$0xff]  }
0x12a1   : > { %4196 = vmatprep.subr.bf16.mxu0 %v4664_v48  ;;  %4230 = vmatprep.mubr.msk.bf16.mxu1 %vm4665_vm10, %v4664_v48  ;;  %v4446_v2 = vld [vmem:[%s4903_s29 + $0x20] sm:$0xff]   ;;  %v4441_v46 = vld [vmem:[%s4901_s23 + $0x8] sm:$0xff]   ;;  %v4447_v58 = vld [vmem:[%s4903_s29 + $0x18] sm:$0xff]  }
0x12a2   : > { %4215 = vmatpush3.bf16.msra.mxu1 %v4443_v41  ;;  %v4442_v29 = vld [vmem:[%s4901_s23] sm:$0xff]   ;;  %v4448_v47 = vld [vmem:[%s4903_s29 + $0x10] sm:$0xff]   ;;  %v4449_v52 = vld [vmem:[%s4903_s29 + $0x8] sm:$0xff]  }
0x12a3   : > { %4216 = vmatprep.subr.bf16.mxu1 %v4664_v48  ;;  %v4450_v53 = vld [vmem:[%s4903_s29] sm:$0xff]   ;;  %v4451_v54 = vld [vmem:[%s4913_s1 + $0x38] sm:$0xff]   ;;  %v4452_v55 = vld [vmem:[%s4913_s1 + $0x30] sm:$0xff]  }
0x12a4   : > { %4197 = vmatpush3.bf16.msra.mxu0 %v4436_v49  ;;  %v3053_v50 = vld [vmem:[#allocation2] sm:$0x1]  ;;  %v4453_v33 = vld [vmem:[%s4913_s1 + $0x28] sm:$0xff]   ;;  %v4455_v31 = vld [vmem:[%s4913_s1 + $0x18] sm:$0xff]  }
0x12a5   : > { %4198 = vmatprep.subr.bf16.mxu0 %v4664_v48  ;;  %v4454_v43 = vld [vmem:[%s4913_s1 + $0x20] sm:$0xff]   ;;  %v4456_v56 = vld [vmem:[%s4913_s1 + $0x10] sm:$0xff]   ;;  %v4457_v16 = vld [vmem:[%s4913_s1 + $0x8] sm:$0xff]  }
0x12a6   : > { %4217 = vmatpush3.bf16.msra.mxu1 %v4444_v42  ;;  %v4458_v62 = vld [vmem:[%s4913_s1] sm:$0xff]  }
0x12a7   : > { %4218 = vmatprep.subr.bf16.mxu1 %v4664_v48  ;;  %v3270_v15 = vld [vmem:[#allocation3] sm:$0x3] }
0x12a8   : > { %4199 = vmatpush3.bf16.msra.mxu0 %v4437_v7 }
0x12a9   : > { %4200 = vmatprep.subr.bf16.mxu0 %v4664_v48 }
0x12aa   : > { %4219 = vmatpush3.bf16.msra.mxu1 %v4445_v19 }
0x12ab   : > { %4220 = vmatprep.subr.bf16.mxu1 %v4664_v48 }
0x12ac   : > { %4201 = vmatpush3.bf16.msra.mxu0 %v4438_v12 }
0x12ad   : > { %4202 = vmatprep.subr.bf16.mxu0 %v4664_v48 }
0x12ae   : > { %4221 = vmatpush3.bf16.msra.mxu1 %v4446_v2 }
0x12af   : > { %4222 = vmatprep.subr.bf16.mxu1 %v4664_v48 }
0x12b0   : > { %4203 = vmatpush3.bf16.msra.mxu0 %v4439_v44 }
0x12b1   : > { %4204 = vmatprep.subr.bf16.mxu0 %v4664_v48 }
0x12b2   : > { %4223 = vmatpush3.bf16.msra.mxu1 %v4447_v58 }
0x12b3   : > { %4224 = vmatprep.subr.bf16.mxu1 %v4664_v48 }
0x12b4   : > { %4205 = vmatpush3.bf16.msra.mxu0 %v4440_v45 }
0x12b5   : > { %4206 = vmatprep.subr.bf16.mxu0 %v4664_v48 }
0x12b6   : > { %4225 = vmatpush3.bf16.msra.mxu1 %v4448_v47 }
0x12b7   : > { %4226 = vmatprep.subr.bf16.mxu1 %v4664_v48 }
0x12b8   : > { %4207 = vmatpush3.bf16.msra.mxu0 %v4441_v46 }
0x12b9   : > { %4208 = vmatprep.subr.bf16.mxu0 %v4664_v48 }
0x12ba   : > { %4227 = vmatpush3.bf16.msra.mxu1 %v4449_v52 }
0x12bb   : > { %4228 = vmatprep.subr.bf16.mxu1 %v4664_v48 }
0x12bc   : > { %4209 = vmatpush3.bf16.msra.mxu0 %v4442_v29 }
0x12bd   : > { %4234 = vmatprep.subr.bf16.mxu0 %v4664_v48 }
0x12be   : > { %4229 = vmatpush3.bf16.msra.mxu1 %v4450_v53 }
0x12bf   : > { %4211 = vmatmul.mubr.bf16.vlgmr.msra.gmra.mxu0 %v3053_v50 }
0x12c0   : > { %4250 = vmatprep.mubr.msk.bf16.mxu0 %vm4665_vm10, %v4664_v48  ;;  %4235 = vmatpush3.bf16.msra.mxu0 %v4451_v54 }
0x12c1   : > { %4231 = vmatmul.mubr.bf16.vlgmr.msra.gmra.mxu1 %v3053_v50  ;;  %4236 = vmatprep.subr.bf16.mxu0 %v4664_v48 }
0x12c4   : > { %4237 = vmatpush3.bf16.msra.mxu0 %v4452_v55 }
0x12c5   : > { %4238 = vmatprep.subr.bf16.mxu0 %v4664_v48 }
0x12c8   : > { %4239 = vmatpush3.bf16.msra.mxu0 %v4453_v33 }
0x12c9   : > { %4240 = vmatprep.subr.bf16.mxu0 %v4664_v48 }
0x12cc   : > { %4241 = vmatpush3.bf16.msra.mxu0 %v4454_v43 }
0x12cd   : > { %4242 = vmatprep.subr.bf16.mxu0 %v4664_v48 }
0x12d0   : > { %4243 = vmatpush3.bf16.msra.mxu0 %v4455_v31 }
0x12d1   : > { %4244 = vmatprep.subr.bf16.mxu0 %v4664_v48 }
0x12d4   : > { %4245 = vmatpush3.bf16.msra.mxu0 %v4456_v56 }
0x12d5   : > { %4246 = vmatprep.subr.bf16.mxu0 %v4664_v48 }
0x12d8   : > { %4247 = vmatpush3.bf16.msra.mxu0 %v4457_v16 }
0x12d9   : > { %4248 = vmatprep.subr.bf16.mxu0 %v4664_v48 }
0x12dc   : > { %4249 = vmatpush3.bf16.msra.mxu0 %v4458_v62 }
0x137f   : > { %v3152_v1 = vpop.f32.mrf.mxu0 }
0x1380   : > { %v3761_v51 = vmul.f32 -1.442695, %v3152_v1 }
0x1381   : > { %v4212_v14 = vpop.f32.mrf.mxu0  ;;  %v3256_v36 = vpop.f32.mrf.mxu1 }
0x1382   : > { %4459 = vpow2.f32 %v3761_v51 }
0x1383   : > { %v3155_v57 = vpop.f32.mrf.mxu0  ;;  %v4232_v3 = vpop.f32.mrf.mxu1 }
0x1385   : > { %v4213_v59 = vpop.f32.mrf.mxu0  ;;  %v3259_v34 = vpop.f32.mrf.mxu1 }
0x1387   : > { %v4233_v4 = vpop.f32.mrf.mxu1 }
0x138f   : > { %v4460_v5 = vpop.eup %4459 }
0x1390   : > { %v3265_v6 = vadd.f32 1.0, %v4460_v5 }
0x1392   : > { %4461 = vrcp.f32 %v3265_v6 }
0x139f   : > { %v4462_v9 = vpop.eup %4461 }
0x13a0   : > { %v3268_v10 = vmul.f32 %v4462_v9, %v3152_v1 }
0x13a2   : > { %v3269_v11 = vmul.f32 %v3268_v10, %v3256_v36 }
0x13a4   : > { %v3271_v13 = vpack.c.bf16 %v3269_v11, %v3269_v11 }
0x13a6   : > { %4251 = vmatmul.mubr.bf16.vlgmr.msra.gmra.mxu0 %v3271_v13 }
0x1466   : > { %v3370_v21 = vpop.f32.mrf.mxu0 }
0x1467   : > { %v3376_v37 = vadd.f32 %v3370_v21, %v3270_v15 }
0x1468   : > { %v4252_v20 = vpop.f32.mrf.mxu0  ;;  %3381 = sbr.rel (%p3770_p6) target bundleno = 5234 (0x1472), region = 182 }
0x1469   : > { %3377 = vst [vmem:[#allocation3] sm:$0x3] %v3376_v37 }
0x146a   : > { %v3373_v35 = vpop.f32.mrf.mxu0 }
0x146c   : > { %v4253_v0 = vpop.f32.mrf.mxu0 }
0x1470   : > { %v3382_v17 = vld [vmem:[#allocation3] sm:$0x3] }
0x1471   : > { %3383 = vst [vmem:[#allocation12] sm:$0x3] %v3382_v17 }
0x1472 PF: > { %p4294_p7 = scmp.eq.s32.totalorder %s4777_s27, 2  ;;  %s4666_s23 = smov [#allocation13]  }
0x1473   : > { %s3401_s29 = sshll.u32 %s4666_s23, 4  ;;  %s3402_s29 = int_to_ptr.vmem [resolvable:$true] %s3401_s29 }
0x1474   : > { %s4541_s1 = scalar_lea.vmem %s3402_s29, 256  ;;  %p4548_p5 = scmp.lt.s32.totalorder %s3402_s29, %s3402_s29 }
0x1475   : > { %p4542_p8 = scmp.ne.s32.totalorder %s3402_s29, %s4541_s1  ;;  %p4549_p9 = scmp.lt.s32.totalorder %s4541_s1, %s4541_s1 }
0x1477   : > { %p4543_p10 = pnand %p4542_p8, %p4294_p7  ;;  %p4550_p12 = por %p4549_p9, %p4548_p5 }
0x1479   : > { %p4544_p11 = pneg %p4543_p10 }
0x147b   : > { %p4551_p13 = pnand %p4550_p12, %p4544_p11 }
0x147d   : > { %4554 = shalt.err (!%p4551_p13)
}
0x147e   : > { %s4667_s20 = smov 64   ;;  %s4668_s15 = smov 4  }
0x147f   : > { %s5698_s18 = sld [smem:[#allocation25_spill]]  ;;  %s4669_s26 = smov [#allocation12]  }
0x1480   : > { %s3391_s28 = sshll.u32 %s4669_s26, 4  ;;  %s4670_s19 = smov [#allocation15]   ;;  %s3392_s28 = int_to_ptr.vmem [resolvable:$true] %s3391_s28 }
0x1481   : > { %s3414_s21 = sshll.u32 %s4670_s19, 4  ;;  %s4565_s30 = scalar_lea.vmem %s3392_s28, 32  ;;  %s3415_s21 = int_to_ptr.vmem [resolvable:$true] %s3414_s21 }
0x1482   : > { %p4566_p0 = scmp.ne.s32.totalorder %s3392_s28, %s4565_s30  ;;  %p4572_p3 = scmp.lt.s32.totalorder %s3392_s28, %s3392_s28 }
0x1483   : > { %p4573_p4 = scmp.lt.s32.totalorder %s4565_s30, %s4565_s30 }
0x1484   : > { %p4567_p1 = pnand %p4566_p0, %p4294_p7 }
0x1485   : > { %4269 = dma.vmem_to_hbm [thread:$0]  (%p4294_p7), %s3402_s29, 256, %s5698_s18, [#allocation14], %s4667_s20, %s4667_s20, %s4668_s15  }
0x1486   : > { %p4568_p2 = pneg %p4567_p1  ;;  %p4574_p6 = por %p4573_p4, %p4572_p3 }
0x1488   : > { %p4575_p8 = pnand %p4574_p6, %p4568_p2 }
0x148a   : > { %4578 = shalt.err (!%p4575_p8)
}
0x148b   : > { %s5699_s23 = sld [smem:[#allocation24_spill]]  ;;  %s4589_s29 = scalar_lea.vmem %s3415_s21, 256 }
0x148c   : > { %p4590_p10 = scmp.ne.s32.totalorder %s3415_s21, %s4589_s29  ;;  %p4596_p9 = scmp.lt.s32.totalorder %s3415_s21, %s3415_s21 }
0x148d   : > { %p4597_p12 = scmp.lt.s32.totalorder %s4589_s29, %s4589_s29 }
0x148e   : > { %p4591_p11 = pnand %p4590_p10, %p4294_p7 }
0x148f   : > { %p4598_p13 = por %p4597_p12, %p4596_p9 }
0x1490   : > { %p4592_p5 = pneg %p4591_p11 }
0x1491   : > { %4267 = dma.vmem_to_hbm [thread:$0]  (%p4294_p7), %s3392_s28, 32, %s5699_s23, [#allocation6]  }
0x1492   : > { %p4599_p0 = pnand %p4598_p13, %p4592_p5 }
0x1494   : > { %4602 = shalt.err (!%p4599_p0)
}
0x1495   : > { %s5700_s17 = sld [smem:[#allocation26_spill]] }
0x149b   : > { %4271 = dma.vmem_to_hbm [thread:$0]  (%p4294_p7), %s3415_s21, 256, %s5700_s17, [#allocation14], %s4667_s20, %s4667_s20, %s4668_s15  }
0x149c   : > { %4634 = dma.done.wait (%p4294_p7), [#allocation6], 32  }
0x149d   : > { %4636 = vsyncadd (%p4294_p7), [#allocation6], 4294967264 }
0x149e   : > { %4638 = dma.done.wait (%p4294_p7), [#allocation14], 512  }
0x149f   : > { %4640 = vsyncadd (%p4294_p7), [#allocation14], 4294966784 }
0x14a0 PF: > { %s5701_s26 = sld [smem:[#allocation20_spill]]  ;;  %s5703_s24 = smov %s4647_s25 }
0x14a1   : > { %s5702_s18 = sld [smem:[#allocation21_spill]] }
0x14a6   : > { %p29_p1 = scmp.ge.s32.totalorder %s5701_s26, 5  }
0x14a7   : > { %s5704_s25 = smov %s5702_s18 }
0x14a8   :  { %31 = sbr.rel (!%p29_p1) target bundleno = 11 (0xb), region = 252 }
0x14ad   :  { %3438 = vsyncpa [#allocation5], 1 }
0x14ae   :  { %3440 = vsyncpa [#allocation5 + $0x1], 1 }
0x14af   :  { %3441 = vsyncpa [#allocation10], 1 }
0x14b0   :  { %3442 = vsyncpa [#allocation6], 1 }
0x14b1   :  { %3444 = vsyncpa [#allocation6 + $0x1], 1 }
0x14b2   :  { %3445 = vsyncpa [#allocation14], 1 }

</bundles_post_ra>
